<compile_context>
chip_gen: v5e
topology: v5e:2x2
jax: 0.10.0
libtpu: 0.0.40
codegen_flags: <defaults>
</compile_context>

<pallas_src>
import jax
import jax.numpy as jnp
from jax.experimental import pallas as pl
from jax.experimental.pallas import tpu as pltpu

LANE = 128                     # vreg lane width; out-channel / class dims pad to this
VMEM_LIMIT = 32 * 1024 * 1024  # explicit scoped-VMEM limit (safe on v5e/v6e/v7x)


def _round_up(x, m):
    return (x + m - 1) // m * m


# ---------------- Pallas kernels ----------------

def _conv3x3s2_relu_kernel(x_ref, w_ref, b_ref, o_ref):
    """Fused dual-encoder 3x3 stride-2 conv + bias + ReLU for one sample.

    x_ref: (4, Ho+1, Wo+1, Cin) bf16  space-to-depth phases of the padded input
    w_ref: (9, Cin, TN)         bf16  per-tap fused [base|enc] weights
    b_ref: (1, TN)              f32
    o_ref: (1, Ho*Wo, TN)       bf16  lane-dense (TN multiple of 128) store
    """
    _, hh, wh, cin = x_ref.shape
    ho, wo = hh - 1, wh - 1
    tn = o_ref.shape[2]
    acc = jnp.zeros((ho * wo, tn), jnp.float32)
    for t in range(9):                        # static unroll: 9 taps -> 9 MXU dots
        ky, kx = divmod(t, 3)
        p = (ky % 2) * 2 + (kx % 2)           # space-to-depth phase plane
        dy, dx = ky // 2, kx // 2             # static 0/1 window offsets
        tap = x_ref[p, dy:dy + ho, dx:dx + wo, :]          # (ho, wo, cin), contiguous
        acc += jnp.dot(tap.reshape(ho * wo, cin), w_ref[t],
                       preferred_element_type=jnp.float32)
    o_ref[0] = jnp.maximum(acc + b_ref[...], 0.0).astype(o_ref.dtype)


def _conv3x3s2_gap_head_kernel(x_ref, w_ref, b_ref, hw_ref, hb_ref, o_ref):
    """Last stage: conv + ReLU + global-average-pool + linear head, one sample.

    The final feature map stays in VMEM (never written back to HBM).
    hw_ref: (Cop, CLSp) f32, hb_ref: (1, CLSp) f32, o_ref: (1, 1, CLSp) f32.
    """
    _, hh, wh, cin = x_ref.shape
    ho, wo = hh - 1, wh - 1
    cop = w_ref.shape[2]
    acc = jnp.zeros((ho * wo, cop), jnp.float32)
    for t in range(9):
        ky, kx = divmod(t, 3)
        p = (ky % 2) * 2 + (kx % 2)
        dy, dx = ky // 2, kx // 2
        tap = x_ref[p, dy:dy + ho, dx:dx + wo, :]
        acc += jnp.dot(tap.reshape(ho * wo, cin), w_ref[t],
                       preferred_element_type=jnp.float32)
    feat = jnp.maximum(acc + b_ref[...], 0.0)             # (Ho*Wo, Cop) f32
    # GAP divides by the REAL spatial extent (spatial dims are never padded).
    pooled = jnp.mean(feat, axis=0, keepdims=True)        # (1, Cop) f32
    o_ref[0] = (jnp.dot(pooled, hw_ref[...],
                        preferred_element_type=jnp.float32) + hb_ref[...])


# ---------------- wrappers ----------------

def _space_to_depth_pad(x):
    """(N,H,W,C) -> (N*4, Ho+1, Wo+1, C) phase planes of the zero-padded input.

    Turns the stride-2 3x3 conv into 9 contiguous static window reads in-kernel
    (offsets 0/1 per tap).  Wrapper cost ~1x activation bytes (vs. the old 9x
    im2col materialization).
    """
    n, h, w, c = x.shape
    ho = (h - 1) // 2 + 1
    wo = (w - 1) // 2 + 1
    hp, wp = 2 * (ho + 1), 2 * (wo + 1)        # pad=1 on left/top, >=1 right/bottom
    xp = jnp.pad(x, ((0, 0), (1, hp - h - 1), (1, wp - w - 1), (0, 0)))
    xs = xp.reshape(n, ho + 1, 2, wo + 1, 2, c)
    xs = xs.transpose(0, 2, 4, 1, 3, 5).reshape(n * 4, ho + 1, wo + 1, c)
    return xs, ho, wo


def conv3x3_s2_relu(x, w_tap, b):
    """x: (N,H,W,Cin_real) bf16; w_tap: (9,Cin_real,Cop) bf16; b: (1,Cop) f32.
    Returns (N, Ho, Wo, Cop) bf16 (Cop is a multiple of 128)."""
    n = x.shape[0]
    cin = x.shape[-1]
    cop = w_tap.shape[2]
    xs, ho, wo = _space_to_depth_pad(x)
    hh, wh = ho + 1, wo + 1
    tn = 256 if cop % 256 == 0 else LANE       # fill v6e/v7x 256-wide MXU when possible
    tn = min(tn, cop)
    # Grid order: batch outer, Cout inner -> the (large) activation block stays
    # resident across Cout tiles; only the small weights re-stream.
    # TODO(synk): swap grid axes for deep stages where weights >> activations,
    # and tile the spatial block for very large feature maps.
    out = pl.pallas_call(
        _conv3x3s2_relu_kernel,
        out_shape=jax.ShapeDtypeStruct((n, ho * wo, cop), jnp.bfloat16),
        grid=(n, cop // tn),
        in_specs=[pl.BlockSpec((4, hh, wh, cin), lambda i, j: (i, 0, 0, 0)),
                  pl.BlockSpec((9, cin, tn), lambda i, j: (0, 0, j)),
                  pl.BlockSpec((1, tn), lambda i, j: (0, j))],
        out_specs=pl.BlockSpec((1, ho * wo, tn), lambda i, j: (i, 0, j)),
        compiler_params=pltpu.CompilerParams(
            dimension_semantics=("parallel", "parallel"),
            vmem_limit_bytes=VMEM_LIMIT),
    )(xs, w_tap, b)
    return out.reshape(n, ho, wo, cop)


def conv3x3_s2_gap_head(x, w_tap, b, hw, hb):
    """Final stage fused with the classification head.  Returns (N, 1, CLSp) f32."""
    n = x.shape[0]
    cin = x.shape[-1]
    cop = w_tap.shape[2]
    clsp = hw.shape[1]
    xs, ho, wo = _space_to_depth_pad(x)
    hh, wh = ho + 1, wo + 1
    # TODO(synk): if Cop ever needs more than one tile, tile Cout and move the
    # GAP + head matmul into a pl.when(last-tile) epilogue with a VMEM accumulator.
    out = pl.pallas_call(
        _conv3x3s2_gap_head_kernel,
        out_shape=jax.ShapeDtypeStruct((n, 1, clsp), jnp.float32),
        grid=(n,),
        in_specs=[pl.BlockSpec((4, hh, wh, cin), lambda i: (i, 0, 0, 0)),
                  pl.BlockSpec((9, cin, cop), lambda i: (0, 0, 0)),
                  pl.BlockSpec((1, cop), lambda i: (0, 0)),
                  pl.BlockSpec((cop, clsp), lambda i: (0, 0)),
                  pl.BlockSpec((1, clsp), lambda i: (0, 0))],
        out_specs=pl.BlockSpec((1, 1, clsp), lambda i: (i, 0, 0)),
        compiler_params=pltpu.CompilerParams(
            dimension_semantics=("parallel",),
            vmem_limit_bytes=VMEM_LIMIT),
    )(xs, w_tap, b, hw, hb)
    return out


# ---------------- parameters ----------------

def init_params(key, in_channels=3, classes=1, widths=(8, 16, 32)):
    """Raw (PyTorch-like) per-encoder parameters."""
    params = {"base": [], "enc": []}
    cin_base = in_channels
    cin_enc = in_channels            # stage 1 of both encoders sees the raw input
    for cout in widths:
        key, k1, k2 = jax.random.split(key, 3)
        params["base"].append(
            (0.1 * jax.random.normal(k1, (3, 3, cin_base, cout), jnp.float32),
             jnp.zeros((cout,), jnp.float32)))
        params["enc"].append(
            (0.1 * jax.random.normal(k2, (3, 3, cin_enc, cout), jnp.float32),
             jnp.zeros((cout,), jnp.float32)))
        cin_base = cout
        cin_enc = 2 * cout           # "double_for_concat": next stage sees the concat
    head_in = 2 * widths[-1]         # final [base|enc] concat width
    key, kh = jax.random.split(key)
    params["head"] = (0.1 * jax.random.normal(kh, (head_in, classes), jnp.float32),
                      jnp.zeros((classes,), jnp.float32))
    return params


def fuse_params(params):
    """One-time fusion: per-stage [base|enc] weights -> (9, Cin_real, Cop) bf16.

    Columns [0,co) read only the base-encoder channels (first cb of the stream);
    columns [co,2co) read the full concat (ce channels) -- this reproduces
    torch.cat([base_out, enc_out], dim=1) exactly.  Cout is padded to 128 for
    lane-dense stores; Cin stays at the REAL channel count.
    """
    fused = {"stages": []}
    for (bw, bb), (ew, eb) in zip(params["base"], params["enc"]):
        cb, co = bw.shape[2], bw.shape[3]
        ce = ew.shape[2]
        cin = max(cb, ce)                       # real stream channels consumed
        cop_real = 2 * co
        cop = _round_up(cop_real, LANE)
        wf = jnp.zeros((3, 3, cin, cop), jnp.float32)
        wf = wf.at[:, :, :cb, :co].set(bw)
        wf = wf.at[:, :, :ce, co:cop_real].set(ew)
        bf = (jnp.zeros((cop,), jnp.float32)
              .at[:co].set(bb).at[co:cop_real].set(eb))
        fused["stages"].append(
            {"w": wf.reshape(9, cin, cop).astype(jnp.bfloat16),
             "b": bf.reshape(1, cop)})
    hw, hb = params["head"]
    cin_h, classes = hw.shape
    clsp = _round_up(classes, LANE)
    cop_last = fused["stages"][-1]["w"].shape[2]
    fused["head_w"] = (jnp.zeros((cop_last, clsp), jnp.float32)
                       .at[:cin_h, :classes].set(hw))
    fused["head_b"] = jnp.zeros((1, clsp), jnp.float32).at[0, :classes].set(hb)
    return fused


# ---------------- model forward ----------------

def concat_model_forward(x_nchw, fused, classes):
    # NCHW (PyTorch convention) -> NHWC for the kernels; bf16 stream, f32 accum.
    x = jnp.transpose(x_nchw, (0, 2, 3, 1)).astype(jnp.bfloat16)
    stages = fused["stages"]
    stream = x
    logits = None
    for s, st in enumerate(stages):
        cin = st["w"].shape[1]
        xin = stream[..., :cin]            # only REAL channels enter the conv
        if s < len(stages) - 1:
            stream = conv3x3_s2_relu(xin, st["w"], st["b"])
        else:
            logits = conv3x3_s2_gap_head(xin, st["w"], st["b"],
                                         fused["head_w"], fused["head_b"])
    return logits[:, 0, :classes]


if __name__ == "__main__":
    key = jax.random.PRNGKey(0)
    kx, kp = jax.random.split(key)
    x = jax.random.normal(kx, (2, 3, 16, 16), jnp.float32)   # (N, C, H, W)
    raw_params = init_params(kp, in_channels=3, classes=1)
    fused_params = fuse_params(raw_params)                   # one-time, outside jit

    fwd = jax.jit(concat_model_forward, static_argnums=2)
    out = fwd(x, fused_params, 1)
    jax.block_until_ready(out)
    assert out.shape == (2, 1) and out.dtype == jnp.float32
    print("KERNEL_OK")
</pallas_src>

<mosaic_0001>
module attributes {stable_mosaic.version = 11 : i64} {
  func.func @_conv3x3s2_relu_kernel(%arg0: i32, %arg1: i32, %arg2: memref<4x9x9x3xbf16, #tpu.memory_space<vmem>>, %arg3: memref<9x3x128xbf16, #tpu.memory_space<vmem>>, %arg4: memref<1x128xf32, #tpu.memory_space<vmem>>, %arg5: memref<1x64x128xbf16, #tpu.memory_space<vmem>>) attributes {dimension_semantics = [#tpu.dimension_semantics<parallel>, #tpu.dimension_semantics<parallel>], iteration_bounds = array<i64: 2, 1>, scalar_prefetch = 0 : i64, scratch_operands = 0 : i64, tpu.core_type = #tpu.core_type<tc>, window_params = [{transform_indices = @transform_0, window_bounds = array<i64: 4, 9, 9, 3>}, {transform_indices = @transform_1, window_bounds = array<i64: 9, 3, 128>}, {transform_indices = @transform_2, window_bounds = array<i64: 1, 128>}, {transform_indices = @transform_3, window_bounds = array<i64: 1, 64, 128>}]} {
    %cst = arith.constant 0.000000e+00 : f32
    %0 = vector.broadcast %cst : f32 to vector<64x128xf32>
    %c0 = arith.constant 0 : index
    %c0_0 = arith.constant 0 : index
    %c0_1 = arith.constant 0 : index
    %c0_2 = arith.constant 0 : index
    %1 = vector.load %arg2[%c0, %c0_0, %c0_1, %c0_2] : memref<4x9x9x3xbf16, #tpu.memory_space<vmem>>, vector<1x8x8x3xbf16>
    %2 = vector.shape_cast %1 : vector<1x8x8x3xbf16> to vector<8x8x3xbf16>
    %3 = vector.shape_cast %2 : vector<8x8x3xbf16> to vector<64x3xbf16>
    %c0_3 = arith.constant 0 : index
    %c0_4 = arith.constant 0 : index
    %c0_5 = arith.constant 0 : index
    %4 = vector.load %arg3[%c0_3, %c0_4, %c0_5] : memref<9x3x128xbf16, #tpu.memory_space<vmem>>, vector<1x3x128xbf16>
    %5 = vector.shape_cast %4 : vector<1x3x128xbf16> to vector<3x128xbf16>
    %cst_6 = arith.constant dense<0.000000e+00> : vector<64x128xf32>
    %6 = tpu.matmul %3, %5, %cst_6 {dimension_numbers = #tpu.dot_dimension_numbers<[1], [0], [0], [1], [0, 0, 1, 1], [], []>} : vector<64x3xbf16>, vector<3x128xbf16>, vector<64x128xf32> -> vector<64x128xf32>
    %7 = arith.addf %0, %6 : vector<64x128xf32>
    %c1 = arith.constant 1 : index
    %c0_7 = arith.constant 0 : index
    %c0_8 = arith.constant 0 : index
    %c0_9 = arith.constant 0 : index
    %8 = vector.load %arg2[%c1, %c0_7, %c0_8, %c0_9] : memref<4x9x9x3xbf16, #tpu.memory_space<vmem>>, vector<1x8x8x3xbf16>
    %9 = vector.shape_cast %8 : vector<1x8x8x3xbf16> to vector<8x8x3xbf16>
    %10 = vector.shape_cast %9 : vector<8x8x3xbf16> to vector<64x3xbf16>
    %c1_10 = arith.constant 1 : index
    %c0_11 = arith.constant 0 : index
    %c0_12 = arith.constant 0 : index
    %11 = vector.load %arg3[%c1_10, %c0_11, %c0_12] : memref<9x3x128xbf16, #tpu.memory_space<vmem>>, vector<1x3x128xbf16>
    %12 = vector.shape_cast %11 : vector<1x3x128xbf16> to vector<3x128xbf16>
    %cst_13 = arith.constant dense<0.000000e+00> : vector<64x128xf32>
    %13 = tpu.matmul %10, %12, %cst_13 {dimension_numbers = #tpu.dot_dimension_numbers<[1], [0], [0], [1], [0, 0, 1, 1], [], []>} : vector<64x3xbf16>, vector<3x128xbf16>, vector<64x128xf32> -> vector<64x128xf32>
    %14 = arith.addf %7, %13 : vector<64x128xf32>
    %c0_14 = arith.constant 0 : index
    %c0_15 = arith.constant 0 : index
    %c1_16 = arith.constant 1 : index
    %c0_17 = arith.constant 0 : index
    %15 = vector.load %arg2[%c0_14, %c0_15, %c1_16, %c0_17] : memref<4x9x9x3xbf16, #tpu.memory_space<vmem>>, vector<1x8x8x3xbf16>
    %16 = vector.shape_cast %15 : vector<1x8x8x3xbf16> to vector<8x8x3xbf16>
    %17 = vector.shape_cast %16 : vector<8x8x3xbf16> to vector<64x3xbf16>
    %c2 = arith.constant 2 : index
    %c0_18 = arith.constant 0 : index
    %c0_19 = arith.constant 0 : index
    %18 = vector.load %arg3[%c2, %c0_18, %c0_19] : memref<9x3x128xbf16, #tpu.memory_space<vmem>>, vector<1x3x128xbf16>
    %19 = vector.shape_cast %18 : vector<1x3x128xbf16> to vector<3x128xbf16>
    %cst_20 = arith.constant dense<0.000000e+00> : vector<64x128xf32>
    %20 = tpu.matmul %17, %19, %cst_20 {dimension_numbers = #tpu.dot_dimension_numbers<[1], [0], [0], [1], [0, 0, 1, 1], [], []>} : vector<64x3xbf16>, vector<3x128xbf16>, vector<64x128xf32> -> vector<64x128xf32>
    %21 = arith.addf %14, %20 : vector<64x128xf32>
    %c2_21 = arith.constant 2 : index
    %c0_22 = arith.constant 0 : index
    %c0_23 = arith.constant 0 : index
    %c0_24 = arith.constant 0 : index
    %22 = vector.load %arg2[%c2_21, %c0_22, %c0_23, %c0_24] : memref<4x9x9x3xbf16, #tpu.memory_space<vmem>>, vector<1x8x8x3xbf16>
    %23 = vector.shape_cast %22 : vector<1x8x8x3xbf16> to vector<8x8x3xbf16>
    %24 = vector.shape_cast %23 : vector<8x8x3xbf16> to vector<64x3xbf16>
    %c3 = arith.constant 3 : index
    %c0_25 = arith.constant 0 : index
    %c0_26 = arith.constant 0 : index
    %25 = vector.load %arg3[%c3, %c0_25, %c0_26] : memref<9x3x128xbf16, #tpu.memory_space<vmem>>, vector<1x3x128xbf16>
    %26 = vector.shape_cast %25 : vector<1x3x128xbf16> to vector<3x128xbf16>
    %cst_27 = arith.constant dense<0.000000e+00> : vector<64x128xf32>
    %27 = tpu.matmul %24, %26, %cst_27 {dimension_numbers = #tpu.dot_dimension_numbers<[1], [0], [0], [1], [0, 0, 1, 1], [], []>} : vector<64x3xbf16>, vector<3x128xbf16>, vector<64x128xf32> -> vector<64x128xf32>
    %28 = arith.addf %21, %27 : vector<64x128xf32>
    %c3_28 = arith.constant 3 : index
    %c0_29 = arith.constant 0 : index
    %c0_30 = arith.constant 0 : index
    %c0_31 = arith.constant 0 : index
    %29 = vector.load %arg2[%c3_28, %c0_29, %c0_30, %c0_31] : memref<4x9x9x3xbf16, #tpu.memory_space<vmem>>, vector<1x8x8x3xbf16>
    %30 = vector.shape_cast %29 : vector<1x8x8x3xbf16> to vector<8x8x3xbf16>
    %31 = vector.shape_cast %30 : vector<8x8x3xbf16> to vector<64x3xbf16>
    %c4 = arith.constant 4 : index
    %c0_32 = arith.constant 0 : index
    %c0_33 = arith.constant 0 : index
    %32 = vector.load %arg3[%c4, %c0_32, %c0_33] : memref<9x3x128xbf16, #tpu.memory_space<vmem>>, vector<1x3x128xbf16>
    %33 = vector.shape_cast %32 : vector<1x3x128xbf16> to vector<3x128xbf16>
    %cst_34 = arith.constant dense<0.000000e+00> : vector<64x128xf32>
    %34 = tpu.matmul %31, %33, %cst_34 {dimension_numbers = #tpu.dot_dimension_numbers<[1], [0], [0], [1], [0, 0, 1, 1], [], []>} : vector<64x3xbf16>, vector<3x128xbf16>, vector<64x128xf32> -> vector<64x128xf32>
    %35 = arith.addf %28, %34 : vector<64x128xf32>
    %c2_35 = arith.constant 2 : index
    %c0_36 = arith.constant 0 : index
    %c1_37 = arith.constant 1 : index
    %c0_38 = arith.constant 0 : index
    %36 = vector.load %arg2[%c2_35, %c0_36, %c1_37, %c0_38] : memref<4x9x9x3xbf16, #tpu.memory_space<vmem>>, vector<1x8x8x3xbf16>
    %37 = vector.shape_cast %36 : vector<1x8x8x3xbf16> to vector<8x8x3xbf16>
    %38 = vector.shape_cast %37 : vector<8x8x3xbf16> to vector<64x3xbf16>
    %c5 = arith.constant 5 : index
    %c0_39 = arith.constant 0 : index
    %c0_40 = arith.constant 0 : index
    %39 = vector.load %arg3[%c5, %c0_39, %c0_40] : memref<9x3x128xbf16, #tpu.memory_space<vmem>>, vector<1x3x128xbf16>
    %40 = vector.shape_cast %39 : vector<1x3x128xbf16> to vector<3x128xbf16>
    %cst_41 = arith.constant dense<0.000000e+00> : vector<64x128xf32>
    %41 = tpu.matmul %38, %40, %cst_41 {dimension_numbers = #tpu.dot_dimension_numbers<[1], [0], [0], [1], [0, 0, 1, 1], [], []>} : vector<64x3xbf16>, vector<3x128xbf16>, vector<64x128xf32> -> vector<64x128xf32>
    %42 = arith.addf %35, %41 : vector<64x128xf32>
    %c0_42 = arith.constant 0 : index
    %c1_43 = arith.constant 1 : index
    %c0_44 = arith.constant 0 : index
    %c0_45 = arith.constant 0 : index
    %43 = vector.load %arg2[%c0_42, %c1_43, %c0_44, %c0_45] : memref<4x9x9x3xbf16, #tpu.memory_space<vmem>>, vector<1x8x8x3xbf16>
    %44 = vector.shape_cast %43 : vector<1x8x8x3xbf16> to vector<8x8x3xbf16>
    %45 = vector.shape_cast %44 : vector<8x8x3xbf16> to vector<64x3xbf16>
    %c6 = arith.constant 6 : index
    %c0_46 = arith.constant 0 : index
    %c0_47 = arith.constant 0 : index
    %46 = vector.load %arg3[%c6, %c0_46, %c0_47] : memref<9x3x128xbf16, #tpu.memory_space<vmem>>, vector<1x3x128xbf16>
    %47 = vector.shape_cast %46 : vector<1x3x128xbf16> to vector<3x128xbf16>
    %cst_48 = arith.constant dense<0.000000e+00> : vector<64x128xf32>
    %48 = tpu.matmul %45, %47, %cst_48 {dimension_numbers = #tpu.dot_dimension_numbers<[1], [0], [0], [1], [0, 0, 1, 1], [], []>} : vector<64x3xbf16>, vector<3x128xbf16>, vector<64x128xf32> -> vector<64x128xf32>
    %49 = arith.addf %42, %48 : vector<64x128xf32>
    %c1_49 = arith.constant 1 : index
    %c1_50 = arith.constant 1 : index
    %c0_51 = arith.constant 0 : index
    %c0_52 = arith.constant 0 : index
    %50 = vector.load %arg2[%c1_49, %c1_50, %c0_51, %c0_52] : memref<4x9x9x3xbf16, #tpu.memory_space<vmem>>, vector<1x8x8x3xbf16>
    %51 = vector.shape_cast %50 : vector<1x8x8x3xbf16> to vector<8x8x3xbf16>
    %52 = vector.shape_cast %51 : vector<8x8x3xbf16> to vector<64x3xbf16>
    %c7 = arith.constant 7 : index
    %c0_53 = arith.constant 0 : index
    %c0_54 = arith.constant 0 : index
    %53 = vector.load %arg3[%c7, %c0_53, %c0_54] : memref<9x3x128xbf16, #tpu.memory_space<vmem>>, vector<1x3x128xbf16>
    %54 = vector.shape_cast %53 : vector<1x3x128xbf16> to vector<3x128xbf16>
    %cst_55 = arith.constant dense<0.000000e+00> : vector<64x128xf32>
    %55 = tpu.matmul %52, %54, %cst_55 {dimension_numbers = #tpu.dot_dimension_numbers<[1], [0], [0], [1], [0, 0, 1, 1], [], []>} : vector<64x3xbf16>, vector<3x128xbf16>, vector<64x128xf32> -> vector<64x128xf32>
    %56 = arith.addf %49, %55 : vector<64x128xf32>
    %c0_56 = arith.constant 0 : index
    %c1_57 = arith.constant 1 : index
    %c1_58 = arith.constant 1 : index
    %c0_59 = arith.constant 0 : index
    %57 = vector.load %arg2[%c0_56, %c1_57, %c1_58, %c0_59] : memref<4x9x9x3xbf16, #tpu.memory_space<vmem>>, vector<1x8x8x3xbf16>
    %58 = vector.shape_cast %57 : vector<1x8x8x3xbf16> to vector<8x8x3xbf16>
    %59 = vector.shape_cast %58 : vector<8x8x3xbf16> to vector<64x3xbf16>
    %c8 = arith.constant 8 : index
    %c0_60 = arith.constant 0 : index
    %c0_61 = arith.constant 0 : index
    %60 = vector.load %arg3[%c8, %c0_60, %c0_61] : memref<9x3x128xbf16, #tpu.memory_space<vmem>>, vector<1x3x128xbf16>
    %61 = vector.shape_cast %60 : vector<1x3x128xbf16> to vector<3x128xbf16>
    %cst_62 = arith.constant dense<0.000000e+00> : vector<64x128xf32>
    %62 = tpu.matmul %59, %61, %cst_62 {dimension_numbers = #tpu.dot_dimension_numbers<[1], [0], [0], [1], [0, 0, 1, 1], [], []>} : vector<64x3xbf16>, vector<3x128xbf16>, vector<64x128xf32> -> vector<64x128xf32>
    %63 = arith.addf %56, %62 : vector<64x128xf32>
    %c0_63 = arith.constant 0 : index
    %c0_64 = arith.constant 0 : index
    %64 = vector.load %arg4[%c0_63, %c0_64] : memref<1x128xf32, #tpu.memory_space<vmem>>, vector<1x128xf32>
    %65 = vector.broadcast %64 : vector<1x128xf32> to vector<64x128xf32>
    %66 = arith.addf %63, %65 : vector<64x128xf32>
    %cst_65 = arith.constant 0.000000e+00 : f32
    %67 = vector.broadcast %cst_65 : f32 to vector<64x128xf32>
    %68 = arith.maximumf %66, %67 : vector<64x128xf32>
    %69 = arith.truncf %68 : vector<64x128xf32> to vector<64x128xbf16>
    %c0_66 = arith.constant 0 : index
    %c0_67 = arith.constant 0 : index
    %c0_68 = arith.constant 0 : index
    %70 = vector.load %arg5[%c0_66, %c0_67, %c0_68] : memref<1x64x128xbf16, #tpu.memory_space<vmem>>, vector<1x64x128xbf16>
    %71 = vector.shape_cast %70 : vector<1x64x128xbf16> to vector<64x128xbf16>
    %72 = vector.shape_cast %69 : vector<64x128xbf16> to vector<1x64x128xbf16>
    tpu.vector_store %arg5[%c0_66, %c0_67, %c0_68], %72 {strides = array<i32>} : memref<1x64x128xbf16, #tpu.memory_space<vmem>>, vector<1x64x128xbf16>,
    return
  }
  func.func @transform_0(%arg0: i32, %arg1: i32) -> (i32, i32, i32, i32) {
    %c0_i32 = arith.constant 0 : i32
    %c0_i32_0 = arith.constant 0 : i32
    %c0_i32_1 = arith.constant 0 : i32
    %c0_i32_2 = arith.constant 0 : i32
    return %arg0, %c0_i32, %c0_i32_0, %c0_i32_1 : i32, i32, i32, i32
  }
  func.func @transform_1(%arg0: i32, %arg1: i32) -> (i32, i32, i32) {
    %c0_i32 = arith.constant 0 : i32
    %c0_i32_0 = arith.constant 0 : i32
    %c0_i32_1 = arith.constant 0 : i32
    return %c0_i32, %c0_i32_0, %arg1 : i32, i32, i32
  }
  func.func @transform_2(%arg0: i32, %arg1: i32) -> (i32, i32) {
    %c0_i32 = arith.constant 0 : i32
    %c0_i32_0 = arith.constant 0 : i32
    return %c0_i32, %arg1 : i32, i32
  }
  func.func @transform_3(%arg0: i32, %arg1: i32) -> (i32, i32, i32) {
    %c0_i32 = arith.constant 0 : i32
    %c0_i32_0 = arith.constant 0 : i32
    return %arg0, %c0_i32, %arg1 : i32, i32, i32
  }
}

module attributes {stable_mosaic.version = 11 : i64} {
  func.func @_conv3x3s2_relu_kernel(%arg0: i32, %arg1: i32, %arg2: memref<4x5x5x16xbf16, #tpu.memory_space<vmem>>, %arg3: memref<9x16x128xbf16, #tpu.memory_space<vmem>>, %arg4: memref<1x128xf32, #tpu.memory_space<vmem>>, %arg5: memref<1x16x128xbf16, #tpu.memory_space<vmem>>) attributes {dimension_semantics = [#tpu.dimension_semantics<parallel>, #tpu.dimension_semantics<parallel>], iteration_bounds = array<i64: 2, 1>, scalar_prefetch = 0 : i64, scratch_operands = 0 : i64, tpu.core_type = #tpu.core_type<tc>, window_params = [{transform_indices = @transform_0, window_bounds = array<i64: 4, 5, 5, 16>}, {transform_indices = @transform_1, window_bounds = array<i64: 9, 16, 128>}, {transform_indices = @transform_2, window_bounds = array<i64: 1, 128>}, {transform_indices = @transform_3, window_bounds = array<i64: 1, 16, 128>}]} {
    %cst = arith.constant 0.000000e+00 : f32
    %0 = vector.broadcast %cst : f32 to vector<16x128xf32>
    %c0 = arith.constant 0 : index
    %c0_0 = arith.constant 0 : index
    %c0_1 = arith.constant 0 : index
    %c0_2 = arith.constant 0 : index
    %1 = vector.load %arg2[%c0, %c0_0, %c0_1, %c0_2] : memref<4x5x5x16xbf16, #tpu.memory_space<vmem>>, vector<1x4x4x16xbf16>
    %2 = vector.shape_cast %1 : vector<1x4x4x16xbf16> to vector<4x4x16xbf16>
    %3 = vector.shape_cast %2 : vector<4x4x16xbf16> to vector<16x16xbf16>
    %c0_3 = arith.constant 0 : index
    %c0_4 = arith.constant 0 : index
    %c0_5 = arith.constant 0 : index
    %4 = vector.load %arg3[%c0_3, %c0_4, %c0_5] : memref<9x16x128xbf16, #tpu.memory_space<vmem>>, vector<1x16x128xbf16>
    %5 = vector.shape_cast %4 : vector<1x16x128xbf16> to vector<16x128xbf16>
    %cst_6 = arith.constant dense<0.000000e+00> : vector<16x128xf32>
    %6 = tpu.matmul %3, %5, %cst_6 {dimension_numbers = #tpu.dot_dimension_numbers<[1], [0], [0], [1], [0, 0, 1, 1], [], []>} : vector<16x16xbf16>, vector<16x128xbf16>, vector<16x128xf32> -> vector<16x128xf32>
    %7 = arith.addf %0, %6 : vector<16x128xf32>
    %c1 = arith.constant 1 : index
    %c0_7 = arith.constant 0 : index
    %c0_8 = arith.constant 0 : index
    %c0_9 = arith.constant 0 : index
    %8 = vector.load %arg2[%c1, %c0_7, %c0_8, %c0_9] : memref<4x5x5x16xbf16, #tpu.memory_space<vmem>>, vector<1x4x4x16xbf16>
    %9 = vector.shape_cast %8 : vector<1x4x4x16xbf16> to vector<4x4x16xbf16>
    %10 = vector.shape_cast %9 : vector<4x4x16xbf16> to vector<16x16xbf16>
    %c1_10 = arith.constant 1 : index
    %c0_11 = arith.constant 0 : index
    %c0_12 = arith.constant 0 : index
    %11 = vector.load %arg3[%c1_10, %c0_11, %c0_12] : memref<9x16x128xbf16, #tpu.memory_space<vmem>>, vector<1x16x128xbf16>
    %12 = vector.shape_cast %11 : vector<1x16x128xbf16> to vector<16x128xbf16>
    %cst_13 = arith.constant dense<0.000000e+00> : vector<16x128xf32>
    %13 = tpu.matmul %10, %12, %cst_13 {dimension_numbers = #tpu.dot_dimension_numbers<[1], [0], [0], [1], [0, 0, 1, 1], [], []>} : vector<16x16xbf16>, vector<16x128xbf16>, vector<16x128xf32> -> vector<16x128xf32>
    %14 = arith.addf %7, %13 : vector<16x128xf32>
    %c0_14 = arith.constant 0 : index
    %c0_15 = arith.constant 0 : index
    %c1_16 = arith.constant 1 : index
    %c0_17 = arith.constant 0 : index
    %15 = vector.load %arg2[%c0_14, %c0_15, %c1_16, %c0_17] : memref<4x5x5x16xbf16, #tpu.memory_space<vmem>>, vector<1x4x4x16xbf16>
    %16 = vector.shape_cast %15 : vector<1x4x4x16xbf16> to vector<4x4x16xbf16>
    %17 = vector.shape_cast %16 : vector<4x4x16xbf16> to vector<16x16xbf16>
    %c2 = arith.constant 2 : index
    %c0_18 = arith.constant 0 : index
    %c0_19 = arith.constant 0 : index
    %18 = vector.load %arg3[%c2, %c0_18, %c0_19] : memref<9x16x128xbf16, #tpu.memory_space<vmem>>, vector<1x16x128xbf16>
    %19 = vector.shape_cast %18 : vector<1x16x128xbf16> to vector<16x128xbf16>
    %cst_20 = arith.constant dense<0.000000e+00> : vector<16x128xf32>
    %20 = tpu.matmul %17, %19, %cst_20 {dimension_numbers = #tpu.dot_dimension_numbers<[1], [0], [0], [1], [0, 0, 1, 1], [], []>} : vector<16x16xbf16>, vector<16x128xbf16>, vector<16x128xf32> -> vector<16x128xf32>
    %21 = arith.addf %14, %20 : vector<16x128xf32>
    %c2_21 = arith.constant 2 : index
    %c0_22 = arith.constant 0 : index
    %c0_23 = arith.constant 0 : index
    %c0_24 = arith.constant 0 : index
    %22 = vector.load %arg2[%c2_21, %c0_22, %c0_23, %c0_24] : memref<4x5x5x16xbf16, #tpu.memory_space<vmem>>, vector<1x4x4x16xbf16>
    %23 = vector.shape_cast %22 : vector<1x4x4x16xbf16> to vector<4x4x16xbf16>
    %24 = vector.shape_cast %23 : vector<4x4x16xbf16> to vector<16x16xbf16>
    %c3 = arith.constant 3 : index
    %c0_25 = arith.constant 0 : index
    %c0_26 = arith.constant 0 : index
    %25 = vector.load %arg3[%c3, %c0_25, %c0_26] : memref<9x16x128xbf16, #tpu.memory_space<vmem>>, vector<1x16x128xbf16>
    %26 = vector.shape_cast %25 : vector<1x16x128xbf16> to vector<16x128xbf16>
    %cst_27 = arith.constant dense<0.000000e+00> : vector<16x128xf32>
    %27 = tpu.matmul %24, %26, %cst_27 {dimension_numbers = #tpu.dot_dimension_numbers<[1], [0], [0], [1], [0, 0, 1, 1], [], []>} : vector<16x16xbf16>, vector<16x128xbf16>, vector<16x128xf32> -> vector<16x128xf32>
    %28 = arith.addf %21, %27 : vector<16x128xf32>
    %c3_28 = arith.constant 3 : index
    %c0_29 = arith.constant 0 : index
    %c0_30 = arith.constant 0 : index
    %c0_31 = arith.constant 0 : index
    %29 = vector.load %arg2[%c3_28, %c0_29, %c0_30, %c0_31] : memref<4x5x5x16xbf16, #tpu.memory_space<vmem>>, vector<1x4x4x16xbf16>
    %30 = vector.shape_cast %29 : vector<1x4x4x16xbf16> to vector<4x4x16xbf16>
    %31 = vector.shape_cast %30 : vector<4x4x16xbf16> to vector<16x16xbf16>
    %c4 = arith.constant 4 : index
    %c0_32 = arith.constant 0 : index
    %c0_33 = arith.constant 0 : index
    %32 = vector.load %arg3[%c4, %c0_32, %c0_33] : memref<9x16x128xbf16, #tpu.memory_space<vmem>>, vector<1x16x128xbf16>
    %33 = vector.shape_cast %32 : vector<1x16x128xbf16> to vector<16x128xbf16>
    %cst_34 = arith.constant dense<0.000000e+00> : vector<16x128xf32>
    %34 = tpu.matmul %31, %33, %cst_34 {dimension_numbers = #tpu.dot_dimension_numbers<[1], [0], [0], [1], [0, 0, 1, 1], [], []>} : vector<16x16xbf16>, vector<16x128xbf16>, vector<16x128xf32> -> vector<16x128xf32>
    %35 = arith.addf %28, %34 : vector<16x128xf32>
    %c2_35 = arith.constant 2 : index
    %c0_36 = arith.constant 0 : index
    %c1_37 = arith.constant 1 : index
    %c0_38 = arith.constant 0 : index
    %36 = vector.load %arg2[%c2_35, %c0_36, %c1_37, %c0_38] : memref<4x5x5x16xbf16, #tpu.memory_space<vmem>>, vector<1x4x4x16xbf16>
    %37 = vector.shape_cast %36 : vector<1x4x4x16xbf16> to vector<4x4x16xbf16>
    %38 = vector.shape_cast %37 : vector<4x4x16xbf16> to vector<16x16xbf16>
    %c5 = arith.constant 5 : index
    %c0_39 = arith.constant 0 : index
    %c0_40 = arith.constant 0 : index
    %39 = vector.load %arg3[%c5, %c0_39, %c0_40] : memref<9x16x128xbf16, #tpu.memory_space<vmem>>, vector<1x16x128xbf16>
    %40 = vector.shape_cast %39 : vector<1x16x128xbf16> to vector<16x128xbf16>
    %cst_41 = arith.constant dense<0.000000e+00> : vector<16x128xf32>
    %41 = tpu.matmul %38, %40, %cst_41 {dimension_numbers = #tpu.dot_dimension_numbers<[1], [0], [0], [1], [0, 0, 1, 1], [], []>} : vector<16x16xbf16>, vector<16x128xbf16>, vector<16x128xf32> -> vector<16x128xf32>
    %42 = arith.addf %35, %41 : vector<16x128xf32>
    %c0_42 = arith.constant 0 : index
    %c1_43 = arith.constant 1 : index
    %c0_44 = arith.constant 0 : index
    %c0_45 = arith.constant 0 : index
    %43 = vector.load %arg2[%c0_42, %c1_43, %c0_44, %c0_45] : memref<4x5x5x16xbf16, #tpu.memory_space<vmem>>, vector<1x4x4x16xbf16>
    %44 = vector.shape_cast %43 : vector<1x4x4x16xbf16> to vector<4x4x16xbf16>
    %45 = vector.shape_cast %44 : vector<4x4x16xbf16> to vector<16x16xbf16>
    %c6 = arith.constant 6 : index
    %c0_46 = arith.constant 0 : index
    %c0_47 = arith.constant 0 : index
    %46 = vector.load %arg3[%c6, %c0_46, %c0_47] : memref<9x16x128xbf16, #tpu.memory_space<vmem>>, vector<1x16x128xbf16>
    %47 = vector.shape_cast %46 : vector<1x16x128xbf16> to vector<16x128xbf16>
    %cst_48 = arith.constant dense<0.000000e+00> : vector<16x128xf32>
    %48 = tpu.matmul %45, %47, %cst_48 {dimension_numbers = #tpu.dot_dimension_numbers<[1], [0], [0], [1], [0, 0, 1, 1], [], []>} : vector<16x16xbf16>, vector<16x128xbf16>, vector<16x128xf32> -> vector<16x128xf32>
    %49 = arith.addf %42, %48 : vector<16x128xf32>
    %c1_49 = arith.constant 1 : index
    %c1_50 = arith.constant 1 : index
    %c0_51 = arith.constant 0 : index
    %c0_52 = arith.constant 0 : index
    %50 = vector.load %arg2[%c1_49, %c1_50, %c0_51, %c0_52] : memref<4x5x5x16xbf16, #tpu.memory_space<vmem>>, vector<1x4x4x16xbf16>
    %51 = vector.shape_cast %50 : vector<1x4x4x16xbf16> to vector<4x4x16xbf16>
    %52 = vector.shape_cast %51 : vector<4x4x16xbf16> to vector<16x16xbf16>
    %c7 = arith.constant 7 : index
    %c0_53 = arith.constant 0 : index
    %c0_54 = arith.constant 0 : index
    %53 = vector.load %arg3[%c7, %c0_53, %c0_54] : memref<9x16x128xbf16, #tpu.memory_space<vmem>>, vector<1x16x128xbf16>
    %54 = vector.shape_cast %53 : vector<1x16x128xbf16> to vector<16x128xbf16>
    %cst_55 = arith.constant dense<0.000000e+00> : vector<16x128xf32>
    %55 = tpu.matmul %52, %54, %cst_55 {dimension_numbers = #tpu.dot_dimension_numbers<[1], [0], [0], [1], [0, 0, 1, 1], [], []>} : vector<16x16xbf16>, vector<16x128xbf16>, vector<16x128xf32> -> vector<16x128xf32>
    %56 = arith.addf %49, %55 : vector<16x128xf32>
    %c0_56 = arith.constant 0 : index
    %c1_57 = arith.constant 1 : index
    %c1_58 = arith.constant 1 : index
    %c0_59 = arith.constant 0 : index
    %57 = vector.load %arg2[%c0_56, %c1_57, %c1_58, %c0_59] : memref<4x5x5x16xbf16, #tpu.memory_space<vmem>>, vector<1x4x4x16xbf16>
    %58 = vector.shape_cast %57 : vector<1x4x4x16xbf16> to vector<4x4x16xbf16>
    %59 = vector.shape_cast %58 : vector<4x4x16xbf16> to vector<16x16xbf16>
    %c8 = arith.constant 8 : index
    %c0_60 = arith.constant 0 : index
    %c0_61 = arith.constant 0 : index
    %60 = vector.load %arg3[%c8, %c0_60, %c0_61] : memref<9x16x128xbf16, #tpu.memory_space<vmem>>, vector<1x16x128xbf16>
    %61 = vector.shape_cast %60 : vector<1x16x128xbf16> to vector<16x128xbf16>
    %cst_62 = arith.constant dense<0.000000e+00> : vector<16x128xf32>
    %62 = tpu.matmul %59, %61, %cst_62 {dimension_numbers = #tpu.dot_dimension_numbers<[1], [0], [0], [1], [0, 0, 1, 1], [], []>} : vector<16x16xbf16>, vector<16x128xbf16>, vector<16x128xf32> -> vector<16x128xf32>
    %63 = arith.addf %56, %62 : vector<16x128xf32>
    %c0_63 = arith.constant 0 : index
    %c0_64 = arith.constant 0 : index
    %64 = vector.load %arg4[%c0_63, %c0_64] : memref<1x128xf32, #tpu.memory_space<vmem>>, vector<1x128xf32>
    %65 = vector.broadcast %64 : vector<1x128xf32> to vector<16x128xf32>
    %66 = arith.addf %63, %65 : vector<16x128xf32>
    %cst_65 = arith.constant 0.000000e+00 : f32
    %67 = vector.broadcast %cst_65 : f32 to vector<16x128xf32>
    %68 = arith.maximumf %66, %67 : vector<16x128xf32>
    %69 = arith.truncf %68 : vector<16x128xf32> to vector<16x128xbf16>
    %c0_66 = arith.constant 0 : index
    %c0_67 = arith.constant 0 : index
    %c0_68 = arith.constant 0 : index
    %70 = vector.load %arg5[%c0_66, %c0_67, %c0_68] : memref<1x16x128xbf16, #tpu.memory_space<vmem>>, vector<1x16x128xbf16>
    %71 = vector.shape_cast %70 : vector<1x16x128xbf16> to vector<16x128xbf16>
    %72 = vector.shape_cast %69 : vector<16x128xbf16> to vector<1x16x128xbf16>
    tpu.vector_store %arg5[%c0_66, %c0_67, %c0_68], %72 {strides = array<i32>} : memref<1x16x128xbf16, #tpu.memory_space<vmem>>, vector<1x16x128xbf16>,
    return
  }
  func.func @transform_0(%arg0: i32, %arg1: i32) -> (i32, i32, i32, i32) {
    %c0_i32 = arith.constant 0 : i32
    %c0_i32_0 = arith.constant 0 : i32
    %c0_i32_1 = arith.constant 0 : i32
    %c0_i32_2 = arith.constant 0 : i32
    return %arg0, %c0_i32, %c0_i32_0, %c0_i32_1 : i32, i32, i32, i32
  }
  func.func @transform_1(%arg0: i32, %arg1: i32) -> (i32, i32, i32) {
    %c0_i32 = arith.constant 0 : i32
    %c0_i32_0 = arith.constant 0 : i32
    %c0_i32_1 = arith.constant 0 : i32
    return %c0_i32, %c0_i32_0, %arg1 : i32, i32, i32
  }
  func.func @transform_2(%arg0: i32, %arg1: i32) -> (i32, i32) {
    %c0_i32 = arith.constant 0 : i32
    %c0_i32_0 = arith.constant 0 : i32
    return %c0_i32, %arg1 : i32, i32
  }
  func.func @transform_3(%arg0: i32, %arg1: i32) -> (i32, i32, i32) {
    %c0_i32 = arith.constant 0 : i32
    %c0_i32_0 = arith.constant 0 : i32
    return %arg0, %c0_i32, %arg1 : i32, i32, i32
  }
}

module attributes {stable_mosaic.version = 11 : i64} {
  func.func @_conv3x3s2_gap_head_kernel(%arg0: i32, %arg1: memref<4x3x3x32xbf16, #tpu.memory_space<vmem>>, %arg2: memref<9x32x128xbf16, #tpu.memory_space<vmem>>, %arg3: memref<1x128xf32, #tpu.memory_space<vmem>>, %arg4: memref<128x128xf32, #tpu.memory_space<vmem>>, %arg5: memref<1x128xf32, #tpu.memory_space<vmem>>, %arg6: memref<1x1x128xf32, #tpu.memory_space<vmem>>) attributes {dimension_semantics = [#tpu.dimension_semantics<parallel>], iteration_bounds = array<i64: 2>, scalar_prefetch = 0 : i64, scratch_operands = 0 : i64, tpu.core_type = #tpu.core_type<tc>, window_params = [{transform_indices = @transform_0, window_bounds = array<i64: 4, 3, 3, 32>}, {pipeline_mode = #tpu.pipeline_mode<synchronous>, transform_indices = @transform_1, window_bounds = array<i64: 9, 32, 128>}, {pipeline_mode = #tpu.pipeline_mode<synchronous>, transform_indices = @transform_2, window_bounds = array<i64: 1, 128>}, {pipeline_mode = #tpu.pipeline_mode<synchronous>, transform_indices = @transform_3, window_bounds = array<i64: 128, 128>}, {pipeline_mode = #tpu.pipeline_mode<synchronous>, transform_indices = @transform_4, window_bounds = array<i64: 1, 128>}, {transform_indices = @transform_5, window_bounds = array<i64: 1, 1, 128>}]} {
    %cst = arith.constant 0.000000e+00 : f32
    %0 = vector.broadcast %cst : f32 to vector<4x128xf32>
    %c0 = arith.constant 0 : index
    %c0_0 = arith.constant 0 : index
    %c0_1 = arith.constant 0 : index
    %c0_2 = arith.constant 0 : index
    %1 = vector.load %arg1[%c0, %c0_0, %c0_1, %c0_2] : memref<4x3x3x32xbf16, #tpu.memory_space<vmem>>, vector<1x2x2x32xbf16>
    %2 = vector.shape_cast %1 : vector<1x2x2x32xbf16> to vector<2x2x32xbf16>
    %3 = vector.shape_cast %2 : vector<2x2x32xbf16> to vector<4x32xbf16>
    %c0_3 = arith.constant 0 : index
    %c0_4 = arith.constant 0 : index
    %c0_5 = arith.constant 0 : index
    %4 = vector.load %arg2[%c0_3, %c0_4, %c0_5] : memref<9x32x128xbf16, #tpu.memory_space<vmem>>, vector<1x32x128xbf16>
    %5 = vector.shape_cast %4 : vector<1x32x128xbf16> to vector<32x128xbf16>
    %cst_6 = arith.constant dense<0.000000e+00> : vector<4x128xf32>
    %6 = tpu.matmul %3, %5, %cst_6 {dimension_numbers = #tpu.dot_dimension_numbers<[1], [0], [0], [1], [0, 0, 1, 1], [], []>} : vector<4x32xbf16>, vector<32x128xbf16>, vector<4x128xf32> -> vector<4x128xf32>
    %7 = arith.addf %0, %6 : vector<4x128xf32>
    %c1 = arith.constant 1 : index
    %c0_7 = arith.constant 0 : index
    %c0_8 = arith.constant 0 : index
    %c0_9 = arith.constant 0 : index
    %8 = vector.load %arg1[%c1, %c0_7, %c0_8, %c0_9] : memref<4x3x3x32xbf16, #tpu.memory_space<vmem>>, vector<1x2x2x32xbf16>
    %9 = vector.shape_cast %8 : vector<1x2x2x32xbf16> to vector<2x2x32xbf16>
    %10 = vector.shape_cast %9 : vector<2x2x32xbf16> to vector<4x32xbf16>
    %c1_10 = arith.constant 1 : index
    %c0_11 = arith.constant 0 : index
    %c0_12 = arith.constant 0 : index
    %11 = vector.load %arg2[%c1_10, %c0_11, %c0_12] : memref<9x32x128xbf16, #tpu.memory_space<vmem>>, vector<1x32x128xbf16>
    %12 = vector.shape_cast %11 : vector<1x32x128xbf16> to vector<32x128xbf16>
    %cst_13 = arith.constant dense<0.000000e+00> : vector<4x128xf32>
    %13 = tpu.matmul %10, %12, %cst_13 {dimension_numbers = #tpu.dot_dimension_numbers<[1], [0], [0], [1], [0, 0, 1, 1], [], []>} : vector<4x32xbf16>, vector<32x128xbf16>, vector<4x128xf32> -> vector<4x128xf32>
    %14 = arith.addf %7, %13 : vector<4x128xf32>
    %c0_14 = arith.constant 0 : index
    %c0_15 = arith.constant 0 : index
    %c1_16 = arith.constant 1 : index
    %c0_17 = arith.constant 0 : index
    %15 = vector.load %arg1[%c0_14, %c0_15, %c1_16, %c0_17] : memref<4x3x3x32xbf16, #tpu.memory_space<vmem>>, vector<1x2x2x32xbf16>
    %16 = vector.shape_cast %15 : vector<1x2x2x32xbf16> to vector<2x2x32xbf16>
    %17 = vector.shape_cast %16 : vector<2x2x32xbf16> to vector<4x32xbf16>
    %c2 = arith.constant 2 : index
    %c0_18 = arith.constant 0 : index
    %c0_19 = arith.constant 0 : index
    %18 = vector.load %arg2[%c2, %c0_18, %c0_19] : memref<9x32x128xbf16, #tpu.memory_space<vmem>>, vector<1x32x128xbf16>
    %19 = vector.shape_cast %18 : vector<1x32x128xbf16> to vector<32x128xbf16>
    %cst_20 = arith.constant dense<0.000000e+00> : vector<4x128xf32>
    %20 = tpu.matmul %17, %19, %cst_20 {dimension_numbers = #tpu.dot_dimension_numbers<[1], [0], [0], [1], [0, 0, 1, 1], [], []>} : vector<4x32xbf16>, vector<32x128xbf16>, vector<4x128xf32> -> vector<4x128xf32>
    %21 = arith.addf %14, %20 : vector<4x128xf32>
    %c2_21 = arith.constant 2 : index
    %c0_22 = arith.constant 0 : index
    %c0_23 = arith.constant 0 : index
    %c0_24 = arith.constant 0 : index
    %22 = vector.load %arg1[%c2_21, %c0_22, %c0_23, %c0_24] : memref<4x3x3x32xbf16, #tpu.memory_space<vmem>>, vector<1x2x2x32xbf16>
    %23 = vector.shape_cast %22 : vector<1x2x2x32xbf16> to vector<2x2x32xbf16>
    %24 = vector.shape_cast %23 : vector<2x2x32xbf16> to vector<4x32xbf16>
    %c3 = arith.constant 3 : index
    %c0_25 = arith.constant 0 : index
    %c0_26 = arith.constant 0 : index
    %25 = vector.load %arg2[%c3, %c0_25, %c0_26] : memref<9x32x128xbf16, #tpu.memory_space<vmem>>, vector<1x32x128xbf16>
    %26 = vector.shape_cast %25 : vector<1x32x128xbf16> to vector<32x128xbf16>
    %cst_27 = arith.constant dense<0.000000e+00> : vector<4x128xf32>
    %27 = tpu.matmul %24, %26, %cst_27 {dimension_numbers = #tpu.dot_dimension_numbers<[1], [0], [0], [1], [0, 0, 1, 1], [], []>} : vector<4x32xbf16>, vector<32x128xbf16>, vector<4x128xf32> -> vector<4x128xf32>
    %28 = arith.addf %21, %27 : vector<4x128xf32>
    %c3_28 = arith.constant 3 : index
    %c0_29 = arith.constant 0 : index
    %c0_30 = arith.constant 0 : index
    %c0_31 = arith.constant 0 : index
    %29 = vector.load %arg1[%c3_28, %c0_29, %c0_30, %c0_31] : memref<4x3x3x32xbf16, #tpu.memory_space<vmem>>, vector<1x2x2x32xbf16>
    %30 = vector.shape_cast %29 : vector<1x2x2x32xbf16> to vector<2x2x32xbf16>
    %31 = vector.shape_cast %30 : vector<2x2x32xbf16> to vector<4x32xbf16>
    %c4 = arith.constant 4 : index
    %c0_32 = arith.constant 0 : index
    %c0_33 = arith.constant 0 : index
    %32 = vector.load %arg2[%c4, %c0_32, %c0_33] : memref<9x32x128xbf16, #tpu.memory_space<vmem>>, vector<1x32x128xbf16>
    %33 = vector.shape_cast %32 : vector<1x32x128xbf16> to vector<32x128xbf16>
    %cst_34 = arith.constant dense<0.000000e+00> : vector<4x128xf32>
    %34 = tpu.matmul %31, %33, %cst_34 {dimension_numbers = #tpu.dot_dimension_numbers<[1], [0], [0], [1], [0, 0, 1, 1], [], []>} : vector<4x32xbf16>, vector<32x128xbf16>, vector<4x128xf32> -> vector<4x128xf32>
    %35 = arith.addf %28, %34 : vector<4x128xf32>
    %c2_35 = arith.constant 2 : index
    %c0_36 = arith.constant 0 : index
    %c1_37 = arith.constant 1 : index
    %c0_38 = arith.constant 0 : index
    %36 = vector.load %arg1[%c2_35, %c0_36, %c1_37, %c0_38] : memref<4x3x3x32xbf16, #tpu.memory_space<vmem>>, vector<1x2x2x32xbf16>
    %37 = vector.shape_cast %36 : vector<1x2x2x32xbf16> to vector<2x2x32xbf16>
    %38 = vector.shape_cast %37 : vector<2x2x32xbf16> to vector<4x32xbf16>
    %c5 = arith.constant 5 : index
    %c0_39 = arith.constant 0 : index
    %c0_40 = arith.constant 0 : index
    %39 = vector.load %arg2[%c5, %c0_39, %c0_40] : memref<9x32x128xbf16, #tpu.memory_space<vmem>>, vector<1x32x128xbf16>
    %40 = vector.shape_cast %39 : vector<1x32x128xbf16> to vector<32x128xbf16>
    %cst_41 = arith.constant dense<0.000000e+00> : vector<4x128xf32>
    %41 = tpu.matmul %38, %40, %cst_41 {dimension_numbers = #tpu.dot_dimension_numbers<[1], [0], [0], [1], [0, 0, 1, 1], [], []>} : vector<4x32xbf16>, vector<32x128xbf16>, vector<4x128xf32> -> vector<4x128xf32>
    %42 = arith.addf %35, %41 : vector<4x128xf32>
    %c0_42 = arith.constant 0 : index
    %c1_43 = arith.constant 1 : index
    %c0_44 = arith.constant 0 : index
    %c0_45 = arith.constant 0 : index
    %43 = vector.load %arg1[%c0_42, %c1_43, %c0_44, %c0_45] : memref<4x3x3x32xbf16, #tpu.memory_space<vmem>>, vector<1x2x2x32xbf16>
    %44 = vector.shape_cast %43 : vector<1x2x2x32xbf16> to vector<2x2x32xbf16>
    %45 = vector.shape_cast %44 : vector<2x2x32xbf16> to vector<4x32xbf16>
    %c6 = arith.constant 6 : index
    %c0_46 = arith.constant 0 : index
    %c0_47 = arith.constant 0 : index
    %46 = vector.load %arg2[%c6, %c0_46, %c0_47] : memref<9x32x128xbf16, #tpu.memory_space<vmem>>, vector<1x32x128xbf16>
    %47 = vector.shape_cast %46 : vector<1x32x128xbf16> to vector<32x128xbf16>
    %cst_48 = arith.constant dense<0.000000e+00> : vector<4x128xf32>
    %48 = tpu.matmul %45, %47, %cst_48 {dimension_numbers = #tpu.dot_dimension_numbers<[1], [0], [0], [1], [0, 0, 1, 1], [], []>} : vector<4x32xbf16>, vector<32x128xbf16>, vector<4x128xf32> -> vector<4x128xf32>
    %49 = arith.addf %42, %48 : vector<4x128xf32>
    %c1_49 = arith.constant 1 : index
    %c1_50 = arith.constant 1 : index
    %c0_51 = arith.constant 0 : index
    %c0_52 = arith.constant 0 : index
    %50 = vector.load %arg1[%c1_49, %c1_50, %c0_51, %c0_52] : memref<4x3x3x32xbf16, #tpu.memory_space<vmem>>, vector<1x2x2x32xbf16>
    %51 = vector.shape_cast %50 : vector<1x2x2x32xbf16> to vector<2x2x32xbf16>
    %52 = vector.shape_cast %51 : vector<2x2x32xbf16> to vector<4x32xbf16>
    %c7 = arith.constant 7 : index
    %c0_53 = arith.constant 0 : index
    %c0_54 = arith.constant 0 : index
    %53 = vector.load %arg2[%c7, %c0_53, %c0_54] : memref<9x32x128xbf16, #tpu.memory_space<vmem>>, vector<1x32x128xbf16>
    %54 = vector.shape_cast %53 : vector<1x32x128xbf16> to vector<32x128xbf16>
    %cst_55 = arith.constant dense<0.000000e+00> : vector<4x128xf32>
    %55 = tpu.matmul %52, %54, %cst_55 {dimension_numbers = #tpu.dot_dimension_numbers<[1], [0], [0], [1], [0, 0, 1, 1], [], []>} : vector<4x32xbf16>, vector<32x128xbf16>, vector<4x128xf32> -> vector<4x128xf32>
    %56 = arith.addf %49, %55 : vector<4x128xf32>
    %c0_56 = arith.constant 0 : index
    %c1_57 = arith.constant 1 : index
    %c1_58 = arith.constant 1 : index
    %c0_59 = arith.constant 0 : index
    %57 = vector.load %arg1[%c0_56, %c1_57, %c1_58, %c0_59] : memref<4x3x3x32xbf16, #tpu.memory_space<vmem>>, vector<1x2x2x32xbf16>
    %58 = vector.shape_cast %57 : vector<1x2x2x32xbf16> to vector<2x2x32xbf16>
    %59 = vector.shape_cast %58 : vector<2x2x32xbf16> to vector<4x32xbf16>
    %c8 = arith.constant 8 : index
    %c0_60 = arith.constant 0 : index
    %c0_61 = arith.constant 0 : index
    %60 = vector.load %arg2[%c8, %c0_60, %c0_61] : memref<9x32x128xbf16, #tpu.memory_space<vmem>>, vector<1x32x128xbf16>
    %61 = vector.shape_cast %60 : vector<1x32x128xbf16> to vector<32x128xbf16>
    %cst_62 = arith.constant dense<0.000000e+00> : vector<4x128xf32>
    %62 = tpu.matmul %59, %61, %cst_62 {dimension_numbers = #tpu.dot_dimension_numbers<[1], [0], [0], [1], [0, 0, 1, 1], [], []>} : vector<4x32xbf16>, vector<32x128xbf16>, vector<4x128xf32> -> vector<4x128xf32>
    %63 = arith.addf %56, %62 : vector<4x128xf32>
    %c0_63 = arith.constant 0 : index
    %c0_64 = arith.constant 0 : index
    %64 = vector.load %arg3[%c0_63, %c0_64] : memref<1x128xf32, #tpu.memory_space<vmem>>, vector<1x128xf32>
    %65 = vector.broadcast %64 : vector<1x128xf32> to vector<4x128xf32>
    %66 = arith.addf %63, %65 : vector<4x128xf32>
    %cst_65 = arith.constant 0.000000e+00 : f32
    %67 = vector.broadcast %cst_65 : f32 to vector<4x128xf32>
    %68 = arith.maximumf %66, %67 : vector<4x128xf32>
    %cst_66 = arith.constant dense<0.000000e+00> : vector<128xf32>
    %69 = vector.multi_reduction <add>, %68, %cst_66 [0] : vector<4x128xf32> to vector<128xf32>
    %70 = vector.shape_cast %69 : vector<128xf32> to vector<1x128xf32>
    %cst_67 = arith.constant 4.000000e+00 : f32
    %71 = vector.broadcast %cst_67 : f32 to vector<1x128xf32>
    %72 = arith.divf %70, %71 : vector<1x128xf32>
    %c0_68 = arith.constant 0 : index
    %c0_69 = arith.constant 0 : index
    %73 = vector.load %arg4[%c0_68, %c0_69] : memref<128x128xf32, #tpu.memory_space<vmem>>, vector<128x128xf32>
    %cst_70 = arith.constant dense<0.000000e+00> : vector<1x128xf32>
    %74 = tpu.matmul %72, %73, %cst_70 {dimension_numbers = #tpu.dot_dimension_numbers<[1], [0], [0], [1], [0, 0, 1, 1], [], []>} : vector<1x128xf32>, vector<128x128xf32>, vector<1x128xf32> -> vector<1x128xf32>
    %c0_71 = arith.constant 0 : index
    %c0_72 = arith.constant 0 : index
    %75 = vector.load %arg5[%c0_71, %c0_72] : memref<1x128xf32, #tpu.memory_space<vmem>>, vector<1x128xf32>
    %76 = arith.addf %74, %75 : vector<1x128xf32>
    %c0_73 = arith.constant 0 : index
    %c0_74 = arith.constant 0 : index
    %c0_75 = arith.constant 0 : index
    %77 = vector.load %arg6[%c0_73, %c0_74, %c0_75] : memref<1x1x128xf32, #tpu.memory_space<vmem>>, vector<1x1x128xf32>
    %78 = vector.shape_cast %77 : vector<1x1x128xf32> to vector<1x128xf32>
    %79 = vector.shape_cast %76 : vector<1x128xf32> to vector<1x1x128xf32>
    tpu.vector_store %arg6[%c0_73, %c0_74, %c0_75], %79 {strides = array<i32>} : memref<1x1x128xf32, #tpu.memory_space<vmem>>, vector<1x1x128xf32>,
    return
  }
  func.func @transform_0(%arg0: i32) -> (i32, i32, i32, i32) {
    %c0_i32 = arith.constant 0 : i32
    %c0_i32_0 = arith.constant 0 : i32
    %c0_i32_1 = arith.constant 0 : i32
    %c0_i32_2 = arith.constant 0 : i32
    return %arg0, %c0_i32, %c0_i32_0, %c0_i32_1 : i32, i32, i32, i32
  }
  func.func @transform_1(%arg0: i32) -> (i32, i32, i32) {
    %c0_i32 = arith.constant 0 : i32
    %c0_i32_0 = arith.constant 0 : i32
    %c0_i32_1 = arith.constant 0 : i32
    %c0_i32_2 = arith.constant 0 : i32
    return %c0_i32, %c0_i32_0, %c0_i32_1 : i32, i32, i32
  }
  func.func @transform_2(%arg0: i32) -> (i32, i32) {
    %c0_i32 = arith.constant 0 : i32
    %c0_i32_0 = arith.constant 0 : i32
    %c0_i32_1 = arith.constant 0 : i32
    return %c0_i32, %c0_i32_0 : i32, i32
  }
  func.func @transform_3(%arg0: i32) -> (i32, i32) {
    %c0_i32 = arith.constant 0 : i32
    %c0_i32_0 = arith.constant 0 : i32
    %c0_i32_1 = arith.constant 0 : i32
    return %c0_i32, %c0_i32_0 : i32, i32
  }
  func.func @transform_4(%arg0: i32) -> (i32, i32) {
    %c0_i32 = arith.constant 0 : i32
    %c0_i32_0 = arith.constant 0 : i32
    %c0_i32_1 = arith.constant 0 : i32
    return %c0_i32, %c0_i32_0 : i32, i32
  }
  func.func @transform_5(%arg0: i32) -> (i32, i32, i32) {
    %c0_i32 = arith.constant 0 : i32
    %c0_i32_0 = arith.constant 0 : i32
    %c0_i32_1 = arith.constant 0 : i32
    return %arg0, %c0_i32, %c0_i32_0 : i32, i32, i32
  }
}

</mosaic_0001>

<bundles_post_ra>
// kernel: concat_model_forward.3
= control target key start
LH: loop header
LB: loop body
LE: loop exit
PB: predicated region body
PF: predicated region fallthrough
CT: control target
= control target key end

     0   :  { %s1787_s12 = smov 0   ;;  %s1789_s13 = smov 0   ;;  %s2110_s0 = inlined_call_operand.vmem [shape: bf16[8,9,9,3], index: 0, kind: input, shape index: {}]   ;;  %s2111_s1 = inlined_call_operand.vmem [shape: bf16[9,3,128], index: 1, kind: input, shape index: {}]   ;;  %s2112_s2 = inlined_call_operand.vmem [shape: f32[1,128], index: 2, kind: input, shape index: {}]   ;;  %s2113_s3 = inlined_call_operand.vmem [shape: bf16[2,64,128], index: 3, kind: output, shape index: {}]  }
   0x1   :  { %s1791_s14 = smov 0  }
   0x2 LB: > { %s25_s15 = sadd.s32 1, %s1760_s13  ;;  %p1445_p0 = scmp.ge.s32.totalorder %s1764_s14, 1  ;;  %s1764_s14 = sphi %s1791_s14, %s13_s14   ;;  %s1760_s13 = sphi %s1789_s13, %s2117_s13   ;;  %s1756_s12 = sphi %s1787_s12, %s2116_s12  }
   0x3   : > { %p27_p1 = scmp.ge.s32.totalorder %s25_s15, 2  ;;  %p170_p2 = scmp.lt.s32.totalorder %s1764_s14, 3 }
   0x5   : > { %s2119_s15 = smov (%p27_p1, %s25_s15), 0  ;;  %p171_p3 = pnand %p1445_p0, %p170_p2 }
   0x6   : > { %s1446_s18 = sshll.u32 (!%p171_p3), %s1756_s12, 2  ;;  %p219_p5 = scmp.lt.s32.totalorder (!%p171_p3), %s1756_s12, 1 }
   0x7   : > { %174 = sbr.rel (%p171_p3) target bundleno = 302 (0x12e), region = 32  ;;  %p206_p4 = scmp.lt.s32.totalorder (!%p171_p3), %s1446_s18, 7 }
   0xc   : > { %v1458_v0 = vld [vmem:[%s2111_s1 + $0x2] sm:$0x3]  ;;  %vm281_vm0 = vcmask 1040384   ;;  %vm282_vm1 = vcmask 1041408   ;;  %v1766_v1 = vmov 65535   ;;  %s2121_s18 = smov (!%p206_p4, %s1446_s18), 7 }
   0xd   : > { %v283_v2 = vsel %vm281_vm0, 4294967295, %v1766_v1  ;;  %v1499_v3 = vld [vmem:[%s2111_s1 + $0x4] sm:$0x3]  ;;  %v1512_v5 = vld [vmem:[%s2111_s1 + $0x6] sm:$0x3]  ;;  %s1715_s27 = smul.u32 72, %s2121_s18 }
   0xe   : > { %v1814_v4 = vsel %vm282_vm1, %v283_v2, 0  ;;  %v236_v6 = vld [vmem:[%s2111_s1] sm:$0x3]  ;;  %v1541_v10 = vld [vmem:[%s2111_s1 + $0x8] sm:$0x3]  ;;  %vm268_vm2 = vcmask 23552  }
   0xf   : > { %v286_v7 = vand.u32 %v1458_v0, %v1814_v4  ;;  %v539_v8 = vand.u32 %v1499_v3, %v1814_v4  ;;  %v622_v9 = vand.u32 %v1512_v5, %v1814_v4  ;;  %v350_v11 = vand.u32 %v1814_v4, %v236_v6  ;;  %v1591_v13 = vld [vmem:[%s2111_s1 + $0xc] sm:$0x3]  ;;  %s1836_s5 = scalar_lea.vmem %s2110_s0, %s1715_s27  ;;  %v1620_v14 = vld [vmem:[%s2111_s1 + $0xe] sm:$0x3]  ;;  %v1578_v15 = vld [vmem:[%s2111_s1 + $0xa] sm:$0x3] }
  0x10   : > { %v705_v12 = vand.u32 %v1541_v10, %v1814_v4  ;;  %v1657_v16 = vld [vmem:[%s2111_s1 + $0x10] sm:$0x3]  ;;  %v1465_v17 = vld [vmem:[%s1836_s5 + $0x58] sm:$0xf]  ;;  %v1670_v18 = vld [vmem:[%s1836_s5 + $0x5c] sm:$0xf0]  ;;  %v982_v24 = vand.u32 %v1591_v13, %v1814_v4  ;;  %v1065_v29 = vand.u32 %v1620_v14, %v1814_v4  ;;  %v899_v30 = vand.u32 %v1578_v15, %v1814_v4 }
  0x11   : > { %1712 = vmatpush.bf16.msra.mxu1 %v286_v7  ;;  %1713 = vmatpush.bf16.msra.mxu2 %v286_v7  ;;  %v1469_v19 = vld [vmem:[%s1836_s5 + $0x68] sm:$0xf]  ;;  %v1466_v20 = vor.u32 %v1670_v18, %v1465_v17  ;;  %v1671_v21 = vld [vmem:[%s1836_s5 + $0x6c] sm:$0xf0]  ;;  %v1473_v22 = vld [vmem:[%s1836_s5 + $0x78] sm:$0xf]  ;;  %v1259_v34 = vand.u32 %v1657_v16, %v1814_v4 }
  0x12   : > { %1714 = vmatpush.bf16.msra.mxu3 %v286_v7  ;;  %295 = vmatpush.bf16.msra.mxu0 %v286_v7  ;;  %v1672_v23 = vld [vmem:[%s1836_s5 + $0x7c] sm:$0xf0]  ;;  %v1470_v25 = vor.u32 %v1671_v21, %v1469_v19  ;;  %v1461_v27 = vld [vmem:[%s1836_s5 + $0x48] sm:$0xf]  ;;  %v1669_v28 = vld [vmem:[%s1836_s5 + $0x4c] sm:$0xf0] }
  0x13   : > { %v1474_v26 = vor.u32 %v1672_v23, %v1473_v22  ;;  %v1462_v31 = vor.u32 %v1669_v28, %v1461_v27  ;;  %v381_v32 = vld [vmem:[%s1836_s5] sm:$0xf]  ;;  %v382_v33 = vld [vmem:[%s1836_s5 + $0x4] sm:$0x1]  ;;  %v383_v35 = vld [vmem:[%s1836_s5 + $0x8] sm:$0xf] }
  0x14   : > { %1476 = vmatmul.msk.bf16.vlgmr.msra.gmra.mxu1 %vm268_vm2, %v1466_v20  ;;  %1477 = vmatmul.msk.bf16.vlgmr.msra.gmra.mxu2 %vm268_vm2, %v1470_v25  ;;  %v384_v36 = vld [vmem:[%s1836_s5 + $0xc] sm:$0x1]  ;;  %v401_v37 = vshrl.u32 %v381_v32, 16  ;;  %v404_v38 = vshll.u32 %v381_v32, 16  ;;  %v410_v39 = vshll.u32 %v382_v33, 16  ;;  %v415_v40 = vshrl.u32 %v383_v35, 16 }
  0x15   : > { %548 = vmatpush.bf16.msrb.mxu2 %v539_v8  ;;  %359 = vmatpush.bf16.msrb.mxu1 %v350_v11  ;;  %v418_v41 = vshll.u32 %v383_v35, 16  ;;  %v424_v42 = vshll.u32 %v384_v36, 16  ;;  %vm397_vm3 = vsmask.f32 3328  ;;  %vm398_vm4 = vsmask.f32 7440 }
  0x16   : > { %631 = vmatpush.bf16.msrb.mxu3 %v622_v9  ;;  %714 = vmatpush.bf16.msrb.mxu0 %v705_v12  ;;  %v403_v43 = vrot.slane %v401_v37, 4  ;;  %v406_v44 = vrot.slane %v404_v38, 5  ;;  %v417_v45 = vrot.slane %v415_v40, 4  ;;  %v412_v48 = vrot.slane %v410_v39, 5  ;;  %v385_v49 = vld [vmem:[%s1836_s5 + $0x10] sm:$0xf]  ;;  %vm1868_vm5 = vmor %vm397_vm3, %vm398_vm4 }
  0x17   : > { %1478 = vmatmul.msk.bf16.vlgmr.msra.gmra.mxu3 %vm268_vm2, %v1474_v26  ;;  %1475 = vmatmul.msk.bf16.vlgmr.msra.gmra.mxu0 %vm268_vm2, %v1462_v31  ;;  %v420_v46 = vrot.slane %v418_v41, 5  ;;  %v426_v52 = vrot.slane %v424_v42, 5  ;;  %v387_v53 = vld [vmem:[%s1836_s5 + $0x18] sm:$0xf]  ;;  %v1481_v54 = vld [vmem:[%s1836_s5] sm:$0xf] }
  0x18   : > { %v407_v47 = vor.u32 %v406_v44, %v403_v43  ;;  %v429_v56 = vshrl.u32 %v385_v49, 16  ;;  %v432_v57 = vshll.u32 %v385_v49, 16  ;;  %v1665_v58 = vld [vmem:[%s1836_s5 + $0x4] sm:$0xf0]  ;;  %v443_v60 = vshrl.u32 %v387_v53, 16  ;;  %s2123_s12 = smov (!%p219_p5, %s1756_s12), 1 }
  0x19   : > { %991 = vmatpush.bf16.msra.mxu2 %v982_v24  ;;  %908 = vmatpush.bf16.msra.mxu1 %v899_v30  ;;  %v421_v51 = vor.u32 %v420_v46, %v417_v45  ;;  %v446_v61 = vshll.u32 %v387_v53, 16  ;;  %v1515_v63 = vld [vmem:[%s1836_s5 + $0x90] sm:$0xf]  ;;  %v1673_v0 = vld [vmem:[%s1836_s5 + $0x94] sm:$0xf0]  ;;  %v1482_v12 = vor.u32 %v1665_v58, %v1481_v54  ;;  %s1664_s18 = sshll.u32 %s2123_s12, 5 }
  0x1a   : > { %1074 = vmatpush.bf16.msra.mxu3 %v1065_v29  ;;  %1268 = vmatpush.bf16.msra.mxu0 %v1259_v34  ;;  %v408_v55 = vrot.slane %v407_v47, 4  ;;  %v431_v1 = vrot.slane %v429_v56, 4  ;;  %v434_v2 = vrot.slane %v432_v57, 5  ;;  %v1544_v5 = vld [vmem:[%s1836_s5 + $0xd8] sm:$0xf]  ;;  %v445_v7 = vrot.slane %v443_v60, 4  ;;  %s2076_s21 = scalar_lea.vmem %s2113_s3, %s1664_s18 }
  0x1b   : > { %v422_v59 = vrot.slane %v421_v51, 4  ;;  %v1677_v6 = vld [vmem:[%s1836_s5 + $0xdc] sm:$0xf0]  ;;  %v448_v8 = vrot.slane %v446_v61, 5  ;;  %v386_v10 = vld [vmem:[%s1836_s5 + $0x14] sm:$0x1]  ;;  %v1516_v14 = vor.u32 %v1673_v0, %v1515_v63 }
  0x1c   : > { %v413_v62 = vsel %vm1868_vm5, %v408_v55, %v412_v48  ;;  %v388_v11 = vld [vmem:[%s1836_s5 + $0x1c] sm:$0x1]  ;;  %v1545_v15 = vor.u32 %v1677_v6, %v1544_v5  ;;  %v435_v16 = vor.u32 %v434_v2, %v431_v1  ;;  %v438_v17 = vshll.u32 %v386_v10, 16  ;;  %v389_v24 = vld [vmem:[%s1836_s5 + $0x20] sm:$0xf] }
  0x1d   : > { %v427_v3 = vsel %vm1868_vm5, %v422_v59, %v426_v52  ;;  %v514_v4 = vunpack.c.l.b16 %v413_v62  ;;  %v449_v18 = vor.u32 %v448_v8, %v445_v7  ;;  %v452_v19 = vshll.u32 %v388_v11, 16  ;;  %v391_v25 = vld [vmem:[%s1836_s5 + $0x28] sm:$0xf]  ;;  %v1485_v32 = vld [vmem:[%s1836_s5 + $0x10] sm:$0xf] }
  0x1e   : > { %v515_v9 = vunpack.c.l.b16 %v427_v3  ;;  %v436_v20 = vrot.slane %v435_v16, 4  ;;  %v440_v21 = vrot.slane %v438_v17, 5  ;;  %v457_v26 = vshrl.u32 %v389_v24, 16  ;;  %v1666_v33 = vld [vmem:[%s1836_s5 + $0x14] sm:$0xf0] }
  0x1f   : > { %v450_v22 = vrot.slane %v449_v18, 4  ;;  %v454_v23 = vrot.slane %v452_v19, 5  ;;  %v460_v27 = vshll.u32 %v389_v24, 16  ;;  %v471_v30 = vshrl.u32 %v391_v25, 16  ;;  %v1519_v36 = vld [vmem:[%s1836_s5 + $0xa0] sm:$0xf] }
  0x20   : > { %v522_v13 = vpack.c.b16 %v515_v9, %v514_v4  ;;  %v441_v28 = vsel %vm1868_vm5, %v436_v20, %v440_v21  ;;  %v474_v31 = vshll.u32 %v391_v25, 16  ;;  %v1674_v37 = vld [vmem:[%s1836_s5 + $0xa4] sm:$0xf0]  ;;  %v1678_v39 = vld [vmem:[%s1836_s5 + $0xec] sm:$0xf0]  ;;  %v459_v40 = vrot.slane %v457_v26, 4 }
  0x21   : > { %v455_v29 = vsel %vm1868_vm5, %v450_v22, %v454_v23  ;;  %v516_v34 = vunpack.c.l.b16 %v441_v28  ;;  %v1548_v38 = vld [vmem:[%s1836_s5 + $0xe8] sm:$0xf]  ;;  %v462_v41 = vrot.slane %v460_v27, 5  ;;  %v473_v42 = vrot.slane %v471_v30, 4  ;;  %v390_v44 = vld [vmem:[%s1836_s5 + $0x24] sm:$0x1] }
  0x22   : > { %v517_v35 = vunpack.c.l.b16 %v455_v29  ;;  %v476_v43 = vrot.slane %v474_v31, 5  ;;  %v392_v45 = vld [vmem:[%s1836_s5 + $0x2c] sm:$0x1]  ;;  %v1486_v46 = vor.u32 %v1666_v33, %v1485_v32  ;;  %v1520_v48 = vor.u32 %v1674_v37, %v1519_v36  ;;  %v393_v55 = vld [vmem:[%s1836_s5 + $0x30] sm:$0xf] }
  0x23   : > { %v1549_v49 = vor.u32 %v1678_v39, %v1548_v38  ;;  %v463_v51 = vor.u32 %v462_v41, %v459_v40  ;;  %v466_v52 = vshll.u32 %v390_v44, 16  ;;  %v480_v54 = vshll.u32 %v392_v45, 16  ;;  %v395_v56 = vld [vmem:[%s1836_s5 + $0x38] sm:$0xf]  ;;  %v394_v7 = vld [vmem:[%s1836_s5 + $0x34] sm:$0x1] }
  0x24   : > { %1495 = vmatmul.msk.bf16.vlgmr.msrb.gmra.mxu1 %vm268_vm2, %v1482_v12  ;;  %1500 = vmatmul.msk.bf16.vlgmr.msrb.gmra.mxu2 %vm268_vm2, %v522_v13  ;;  %v523_v47 = vpack.c.b16 %v517_v35, %v516_v34  ;;  %v477_v53 = vor.u32 %v476_v43, %v473_v42  ;;  %v485_v61 = vshrl.u32 %v393_v55, 16  ;;  %v488_v62 = vshll.u32 %v393_v55, 16  ;;  %v396_v8 = vld [vmem:[%s1836_s5 + $0x3c] sm:$0x1]  ;;  %v1489_v9 = vld [vmem:[%s1836_s5 + $0x20] sm:$0xf] }
  0x25   : > { %v464_v57 = vrot.slane %v463_v51, 4  ;;  %v468_v58 = vrot.slane %v466_v52, 5  ;;  %v482_v60 = vrot.slane %v480_v54, 5  ;;  %v499_v63 = vshrl.u32 %v395_v56, 16  ;;  %v1667_v10 = vld [vmem:[%s1836_s5 + $0x24] sm:$0xf0] }
  0x26   : > { %v478_v59 = vrot.slane %v477_v53, 4  ;;  %v502_v0 = vshll.u32 %v395_v56, 16  ;;  %v487_v3 = vrot.slane %v485_v61, 4  ;;  %v490_v4 = vrot.slane %v488_v62, 5  ;;  %v1523_v13 = vld [vmem:[%s1836_s5 + $0xb0] sm:$0xf] }
  0x27   : > { %1529 = vmatmul.msk.bf16.vlgmr.msrb.gmra.mxu3 %vm268_vm2, %v1516_v14  ;;  %1558 = vmatmul.msk.bf16.vlgmr.msrb.gmra.mxu0 %vm268_vm2, %v1545_v15  ;;  %v469_v1 = vsel %vm1868_vm5, %v464_v57, %v468_v58  ;;  %v501_v5 = vrot.slane %v499_v63, 4  ;;  %v1675_v14 = vld [vmem:[%s1836_s5 + $0xb4] sm:$0xf0]  ;;  %v1679_v16 = vld [vmem:[%s1836_s5 + $0xfc] sm:$0xf0]  ;;  %v494_v18 = vshll.u32 %v394_v7, 16  ;;  %v1490_v21 = vor.u32 %v1667_v10, %v1489_v9 }
  0x28   : > { %v483_v2 = vsel %vm1868_vm5, %v478_v59, %v482_v60  ;;  %v504_v6 = vrot.slane %v502_v0, 5  ;;  %v518_v11 = vunpack.c.l.b16 %v469_v1  ;;  %v1552_v15 = vld [vmem:[%s1836_s5 + $0xf8] sm:$0xf]  ;;  %v491_v17 = vor.u32 %v490_v4, %v487_v3  ;;  %v1562_v29 = vld [vmem:[%s1836_s5 + $0x90] sm:$0xf] }
  0x29   : > { %v519_v12 = vunpack.c.l.b16 %v483_v2  ;;  %v508_v20 = vshll.u32 %v396_v8, 16  ;;  %v1524_v23 = vor.u32 %v1675_v14, %v1523_v13  ;;  %v1553_v24 = vor.u32 %v1679_v16, %v1552_v15  ;;  %v1564_v30 = vld [vmem:[%s1836_s5 + $0x98] sm:$0xf]  ;;  %v1641_v31 = vld [vmem:[%s1836_s5 + $0x8] sm:$0xf] }
  0x2a   : > { %v505_v19 = vor.u32 %v504_v6, %v501_v5  ;;  %v492_v25 = vrot.slane %v491_v17, 4  ;;  %v496_v26 = vrot.slane %v494_v18, 5  ;;  %v1643_v32 = vld [vmem:[%s1836_s5 + $0x10] sm:$0xf]  ;;  %v761_v35 = vshrl.u32 %v1562_v29, 16 }
  0x2b   : > { %v524_v22 = vpack.c.b16 %v519_v12, %v518_v11  ;;  %v510_v28 = vrot.slane %v508_v20, 5  ;;  %v764_v36 = vshll.u32 %v1562_v29, 16  ;;  %v775_v37 = vshrl.u32 %v1564_v30, 16  ;;  %v1493_v43 = vld [vmem:[%s1836_s5 + $0x30] sm:$0xf] }
  0x2c   : > { %v506_v27 = vrot.slane %v505_v19, 4  ;;  %v497_v33 = vsel %vm1868_vm5, %v492_v25, %v496_v26  ;;  %v778_v38 = vshll.u32 %v1564_v30, 16  ;;  %v1121_v39 = vshrl.u32 %v1641_v31, 16  ;;  %v1668_v44 = vld [vmem:[%s1836_s5 + $0x34] sm:$0xf0] }
  0x2d   : > { %v1124_v40 = vshll.u32 %v1641_v31, 16  ;;  %v1135_v41 = vshrl.u32 %v1643_v32, 16  ;;  %v1138_v42 = vshll.u32 %v1643_v32, 16  ;;  %v520_v45 = vunpack.c.l.b16 %v497_v33  ;;  %v1565_v55 = vld [vmem:[%s1836_s5 + $0x9c] sm:$0x1] }
  0x2e   : > { %v511_v34 = vsel %vm1868_vm5, %v506_v27, %v510_v28  ;;  %v763_v51 = vrot.slane %v761_v35, 4  ;;  %v766_v52 = vrot.slane %v764_v36, 5  ;;  %v777_v53 = vrot.slane %v775_v37, 4  ;;  %v1642_v60 = vld [vmem:[%s1836_s5 + $0xc] sm:$0x1] }
  0x2f   : > { %v780_v54 = vrot.slane %v778_v38, 5  ;;  %v1123_v56 = vrot.slane %v1121_v39, 4  ;;  %v1126_v57 = vrot.slane %v1124_v40, 5  ;;  %v1137_v58 = vrot.slane %v1135_v41, 4  ;;  %v1644_v61 = vld [vmem:[%s1836_s5 + $0x14] sm:$0x1] }
  0x30   : > { %v1140_v59 = vrot.slane %v1138_v42, 5  ;;  %v1494_v62 = vor.u32 %v1668_v44, %v1493_v43  ;;  %v1556_v1 = vld [vmem:[%s1836_s5 + $0x108] sm:$0xf]  ;;  %v1680_v2 = vld [vmem:[%s1836_s5 + $0x10c] sm:$0xf0]  ;;  %v767_v3 = vor.u32 %v766_v52, %v763_v51  ;;  %v784_v6 = vshll.u32 %v1565_v55, 16 }
  0x31   : > { %v781_v5 = vor.u32 %v780_v54, %v777_v53  ;;  %v1127_v7 = vor.u32 %v1126_v57, %v1123_v56  ;;  %v1130_v8 = vshll.u32 %v1642_v60, 16  ;;  %v1144_v10 = vshll.u32 %v1644_v61, 16  ;;  %v1566_v12 = vld [vmem:[%s1836_s5 + $0xa0] sm:$0xf]  ;;  %v1568_v13 = vld [vmem:[%s1836_s5 + $0xa8] sm:$0xf] }
  0x32   : > { %v1141_v9 = vor.u32 %v1140_v59, %v1137_v58  ;;  %v1557_v11 = vor.u32 %v1680_v2, %v1556_v1  ;;  %v768_v14 = vrot.slane %v767_v3, 4  ;;  %v786_v17 = vrot.slane %v784_v6, 5  ;;  %v1645_v26 = vld [vmem:[%s1836_s5 + $0x18] sm:$0xf]  ;;  %v1647_v27 = vld [vmem:[%s1836_s5 + $0x20] sm:$0xf] }
  0x33   : > { %v782_v16 = vrot.slane %v781_v5, 4  ;;  %v1128_v18 = vrot.slane %v1127_v7, 4  ;;  %v1132_v19 = vrot.slane %v1130_v8, 5  ;;  %v806_v25 = vshll.u32 %v1568_v13, 16  ;;  %v1567_v32 = vld [vmem:[%s1836_s5 + $0xa4] sm:$0x1] }
  0x34   : > { %1496 = vmatmul.msk.bf16.gmra.mxu1 %vm268_vm2, %v1486_v46  ;;  %1501 = vmatmul.msk.bf16.gmra.mxu2 %vm268_vm2, %v523_v47  ;;  %v521_v46 = vunpack.c.l.b16 %v511_v34  ;;  %v1527_v47 = vld [vmem:[%s1836_s5 + $0xc0] sm:$0xf]  ;;  %v1142_v20 = vrot.slane %v1141_v9, 4  ;;  %v1569_v37 = vld [vmem:[%s1836_s5 + $0xac] sm:$0x1]  ;;  %v1149_v38 = vshrl.u32 %v1645_v26, 16 }
  0x35   : > { %v787_v29 = vsel %vm1868_vm5, %v782_v16, %v786_v17  ;;  %v1133_v30 = vsel %vm1868_vm5, %v1128_v18, %v1132_v19  ;;  %v808_v36 = vrot.slane %v806_v25, 5  ;;  %v1152_v39 = vshll.u32 %v1645_v26, 16  ;;  %v1594_v44 = vld [vmem:[%s1836_s5 + $0x8] sm:$0xf]  ;;  %v1646_v60 = vld [vmem:[%s1836_s5 + $0x1c] sm:$0x1] }
  0x36   : > { %v525_v63 = vpack.c.b16 %v521_v46, %v520_v45  ;;  %v1163_v40 = vshrl.u32 %v1647_v27, 16  ;;  %v1166_v41 = vshll.u32 %v1647_v27, 16  ;;  %v875_v43 = vunpack.c.l.b16 %v787_v29  ;;  %v1681_v45 = vld [vmem:[%s1836_s5 + $0xc] sm:$0xf0]  ;;  %v1648_v61 = vld [vmem:[%s1836_s5 + $0x24] sm:$0x1] }
  0x37   : > { %1530 = vmatmul.msk.bf16.gmra.mxu3 %vm268_vm2, %v1520_v48  ;;  %1559 = vmatmul.msk.bf16.gmra.mxu0 %vm268_vm2, %v1549_v49  ;;  %v1676_v48 = vld [vmem:[%s1836_s5 + $0xc4] sm:$0xf0]  ;;  %v1563_v49 = vld [vmem:[%s1836_s5 + $0x94] sm:$0x1]  ;;  %v1234_v46 = vunpack.c.l.b16 %v1133_v30  ;;  %v798_v52 = vshll.u32 %v1567_v32, 16  ;;  %v812_v54 = vshll.u32 %v1569_v37, 16 }
  0x38   : > { %v1528_v0 = vor.u32 %v1676_v48, %v1527_v47  ;;  %v770_v4 = vshll.u32 %v1563_v49, 16  ;;  %v1623_v48 = vld [vmem:[%s1836_s5 + $0x50] sm:$0xf]  ;;  %v1685_v49 = vld [vmem:[%s1836_s5 + $0x54] sm:$0xf0]  ;;  %v1151_v55 = vrot.slane %v1149_v38, 4 }
  0x39   : > { %v1154_v56 = vrot.slane %v1152_v39, 5  ;;  %v1165_v57 = vrot.slane %v1163_v40, 4  ;;  %v1168_v58 = vrot.slane %v1166_v41, 5  ;;  %v800_v2 = vrot.slane %v798_v52, 5  ;;  %v1570_v9 = vld [vmem:[%s1836_s5 + $0xb0] sm:$0xf] }
  0x3a   : > { %v772_v15 = vrot.slane %v770_v4, 5  ;;  %v814_v4 = vrot.slane %v812_v54, 5  ;;  %v1158_v6 = vshll.u32 %v1646_v60, 16  ;;  %v1172_v8 = vshll.u32 %v1648_v61, 16  ;;  %v1651_v18 = vld [vmem:[%s1836_s5 + $0x30] sm:$0xf] }
  0x3b   : > { %v1155_v5 = vor.u32 %v1154_v56, %v1151_v55  ;;  %v1169_v7 = vor.u32 %v1168_v58, %v1165_v57  ;;  %v817_v19 = vshrl.u32 %v1570_v9, 16  ;;  %v1191_v25 = vshrl.u32 %v1651_v18, 16  ;;  %v1682_v32 = vld [vmem:[%s1836_s5 + $0x1c] sm:$0xf0]  ;;  %v1571_v38 = vld [vmem:[%s1836_s5 + $0xb4] sm:$0x1] }
  0x3c   : > { %v773_v28 = vsel %vm1868_vm5, %v768_v14, %v772_v15  ;;  %v1160_v15 = vrot.slane %v1158_v6, 5  ;;  %v1174_v17 = vrot.slane %v1172_v8, 5  ;;  %v1194_v26 = vshll.u32 %v1651_v18, 16  ;;  %v1573_v39 = vld [vmem:[%s1836_s5 + $0xbc] sm:$0x1] }
  0x3d   : > { %v874_v42 = vunpack.c.l.b16 %v773_v28  ;;  %v1156_v14 = vrot.slane %v1155_v5, 4  ;;  %v1170_v16 = vrot.slane %v1169_v7, 4  ;;  %v826_v52 = vshll.u32 %v1571_v38, 16  ;;  %v1574_v6 = vld [vmem:[%s1836_s5 + $0xc0] sm:$0xf] }
  0x3e   : > { %v840_v54 = vshll.u32 %v1573_v39, 16  ;;  %v1576_v7 = vld [vmem:[%s1836_s5 + $0xc8] sm:$0xf] }
  0x3f   : > { %v882_v59 = vpack.c.b16 %v875_v43, %v874_v42  ;;  %v1161_v29 = vsel %vm1868_vm5, %v1156_v14, %v1160_v15  ;;  %v1175_v30 = vsel %vm1868_vm5, %v1170_v16, %v1174_v17  ;;  %v1686_v42 = vld [vmem:[%s1836_s5 + $0x64] sm:$0xf0]  ;;  %v859_v14 = vshrl.u32 %v1576_v7, 16 }
  0x40   : > { %v1236_v43 = vunpack.c.l.b16 %v1161_v29  ;;  %v862_v15 = vshll.u32 %v1576_v7, 16  ;;  %v1635_v7 = vld [vmem:[%s1836_s5 + $0x80] sm:$0xf] }
  0x44   : > { %1497 = vmatmul.msk.bf16.gmra.mxu1 %vm268_vm2, %v1490_v21  ;;  %1502 = vmatmul.msk.bf16.gmra.mxu2 %vm268_vm2, %v524_v22  ;;  %v1146_v21 = vrot.slane %v1144_v10, 5  ;;  %v789_v22 = vshrl.u32 %v1566_v12, 16  ;;  %v1572_v10 = vld [vmem:[%s1836_s5 + $0xb8] sm:$0xf] }
  0x46   : > { %v1147_v31 = vsel %vm1868_vm5, %v1142_v20, %v1146_v21  ;;  %v791_v33 = vrot.slane %v789_v22, 4  ;;  %v820_v20 = vshll.u32 %v1570_v9, 16  ;;  %v831_v21 = vshrl.u32 %v1572_v10, 16 }
  0x47   : > { %1531 = vmatmul.msk.bf16.gmra.mxu3 %vm268_vm2, %v1524_v23  ;;  %1560 = vmatmul.msk.bf16.gmra.mxu0 %vm268_vm2, %v1553_v24  ;;  %v792_v23 = vshll.u32 %v1566_v12, 16  ;;  %v803_v24 = vshrl.u32 %v1568_v13, 16  ;;  %v1235_v47 = vunpack.c.l.b16 %v1147_v31  ;;  %v1649_v13 = vld [vmem:[%s1836_s5 + $0x28] sm:$0xf]  ;;  %v834_v22 = vshll.u32 %v1572_v10, 16 }
  0x48   : > { %v1598_v31 = vld [vmem:[%s1836_s5 + $0x18] sm:$0xf] }
  0x49   : > { %v794_v34 = vrot.slane %v792_v23, 5  ;;  %v805_v35 = vrot.slane %v803_v24, 4  ;;  %v1177_v23 = vshrl.u32 %v1649_v13, 16  ;;  %v1180_v24 = vshll.u32 %v1649_v13, 16  ;;  %v1653_v10 = vld [vmem:[%s1836_s5 + $0x38] sm:$0xf] }
  0x4a   : > { %v836_v37 = vrot.slane %v834_v22, 5  ;;  %v1599_v55 = vor.u32 %v1682_v32, %v1598_v31  ;;  %v848_v13 = vshll.u32 %v1574_v6, 16  ;;  %v1205_v18 = vshrl.u32 %v1653_v10, 16 }
  0x4b   : > { %v795_v51 = vor.u32 %v794_v34, %v791_v33  ;;  %v809_v53 = vor.u32 %v808_v36, %v805_v35  ;;  %v1627_v33 = vld [vmem:[%s1836_s5 + $0x60] sm:$0xf]  ;;  %v819_v34 = vrot.slane %v817_v19, 4  ;;  %v822_v35 = vrot.slane %v820_v20, 5 }
  0x4c   : > { %v833_v36 = vrot.slane %v831_v21, 4  ;;  %v1179_v40 = vrot.slane %v1177_v23, 4  ;;  %v1182_v41 = vrot.slane %v1180_v24, 5  ;;  %v1628_v56 = vor.u32 %v1686_v42, %v1627_v33  ;;  %v1602_v24 = vld [vmem:[%s1836_s5 + $0x28] sm:$0xf] }
  0x4d   : > { %v796_v1 = vrot.slane %v795_v51, 4  ;;  %v810_v3 = vrot.slane %v809_v53, 4  ;;  %v823_v51 = vor.u32 %v822_v35, %v819_v34  ;;  %v1208_v19 = vshll.u32 %v1653_v10, 16  ;;  %v1575_v34 = vld [vmem:[%s1836_s5 + $0xc4] sm:$0x1] }
  0x4e   : > { %v837_v53 = vor.u32 %v836_v37, %v833_v36  ;;  %v1183_v57 = vor.u32 %v1182_v41, %v1179_v40  ;;  %v850_v29 = vrot.slane %v848_v13, 5  ;;  %v864_v31 = vrot.slane %v862_v15, 5  ;;  %v1577_v35 = vld [vmem:[%s1836_s5 + $0xcc] sm:$0x1] }
  0x4f   : > { %v815_v12 = vsel %vm1868_vm5, %v810_v3, %v814_v4  ;;  %v1207_v36 = vrot.slane %v1205_v18, 4  ;;  %v1210_v37 = vrot.slane %v1208_v19, 5 }
  0x50   : > { %v877_v28 = vunpack.c.l.b16 %v815_v12  ;;  %v845_v12 = vshrl.u32 %v1574_v6, 16  ;;  %v1684_v6 = vld [vmem:[%s1836_s5 + $0x3c] sm:$0xf0] }
  0x54   : > { %1498 = vmatmul.msk.bf16.gmra.mxu1 %vm268_vm2, %v1494_v62  ;;  %1503 = vmatmul.msk.bf16.gmra.mxu2 %vm268_vm2, %v525_v63  ;;  %v1595_v62 = vor.u32 %v1681_v45, %v1594_v44  ;;  %v1624_v63 = vor.u32 %v1685_v49, %v1623_v48  ;;  %v1237_v44 = vunpack.c.l.b16 %v1175_v30  ;;  %v1650_v45 = vld [vmem:[%s1836_s5 + $0x2c] sm:$0x1]  ;;  %v1652_v49 = vld [vmem:[%s1836_s5 + $0x34] sm:$0x1]  ;;  %v861_v30 = vrot.slane %v859_v14, 4 }
  0x55   : > { %v1186_v58 = vshll.u32 %v1650_v45, 16  ;;  %v1200_v61 = vshll.u32 %v1652_v49, 16 }
  0x57   : > { %1532 = vmatmul.msk.bf16.gmra.mxu3 %vm268_vm2, %v1528_v0  ;;  %1561 = vmatmul.msk.bf16.gmra.mxu0 %vm268_vm2, %v1557_v11  ;;  %v1242_v0 = vpack.c.b16 %v1235_v47, %v1234_v46  ;;  %v801_v11 = vsel %vm1868_vm5, %v796_v1, %v800_v2  ;;  %v1193_v46 = vrot.slane %v1191_v25, 4  ;;  %v1196_v47 = vrot.slane %v1194_v26, 5  ;;  %v1683_v25 = vld [vmem:[%s1836_s5 + $0x2c] sm:$0xf0] }
  0x58   : > { %v876_v27 = vunpack.c.l.b16 %v801_v11  ;;  %v842_v1 = vrot.slane %v840_v54, 5  ;;  %v1184_v2 = vrot.slane %v1183_v57, 4  ;;  %v1188_v3 = vrot.slane %v1186_v58, 5  ;;  %v1655_v11 = vld [vmem:[%s1836_s5 + $0x40] sm:$0xf] }
  0x59   : > { %v1197_v60 = vor.u32 %v1196_v47, %v1193_v46  ;;  %v1202_v5 = vrot.slane %v1200_v61, 5  ;;  %v1219_v20 = vshrl.u32 %v1655_v11, 16  ;;  %v1222_v21 = vshll.u32 %v1655_v11, 16  ;;  %v1631_v26 = vld [vmem:[%s1836_s5 + $0x70] sm:$0xf] }
  0x5a   : > { %v883_v48 = vpack.c.b16 %v877_v28, %v876_v27  ;;  %v1189_v16 = vsel %vm1868_vm5, %v1184_v2, %v1188_v3  ;;  %v1687_v27 = vld [vmem:[%s1836_s5 + $0x74] sm:$0xf0]  ;;  %v847_v28 = vrot.slane %v845_v12, 4  ;;  %v1603_v41 = vor.u32 %v1683_v25, %v1602_v24 }
  0x5b   : > { %v1198_v4 = vrot.slane %v1197_v60, 4  ;;  %v1238_v32 = vunpack.c.l.b16 %v1189_v16  ;;  %v1221_v38 = vrot.slane %v1219_v20, 4  ;;  %v1224_v39 = vrot.slane %v1222_v21, 5 }
  0x5c   : > { %v1632_v42 = vor.u32 %v1687_v27, %v1631_v26  ;;  %v851_v45 = vor.u32 %v850_v29, %v847_v28  ;;  %v854_v46 = vshll.u32 %v1575_v34, 16  ;;  %v865_v47 = vor.u32 %v864_v31, %v861_v30 }
  0x5d   : > { %v1203_v17 = vsel %vm1868_vm5, %v1198_v4, %v1202_v5  ;;  %v1606_v5 = vld [vmem:[%s1836_s5 + $0x38] sm:$0xf] }
  0x5e   : > { %v1239_v33 = vunpack.c.l.b16 %v1203_v17  ;;  %v866_v57 = vrot.slane %v865_v47, 4  ;;  %v1607_v13 = vor.u32 %v1684_v6, %v1606_v5 }
  0x60   : > { %v1244_v49 = vpack.c.b16 %v1239_v33, %v1238_v32 }
  0x64   : > { %1579 = vmatmul.msk.bf16.vlgmr.msra.gmra.mxu1 %vm268_vm2, %v882_v59  ;;  %1608 = vmatmul.msk.bf16.vlgmr.msra.gmra.mxu2 %vm268_vm2, %v1595_v62  ;;  %v1243_v59 = vpack.c.b16 %v1237_v44, %v1236_v43  ;;  %v824_v62 = vrot.slane %v823_v51, 4  ;;  %v1654_v43 = vld [vmem:[%s1836_s5 + $0x3c] sm:$0x1]  ;;  %v1656_v44 = vld [vmem:[%s1836_s5 + $0x44] sm:$0x1]  ;;  %v1211_v51 = vor.u32 %v1210_v37, %v1207_v36 }
  0x65   : > { %v1228_v54 = vshll.u32 %v1656_v44, 16 }
  0x67   : > { %1637 = vmatmul.msk.bf16.vlgmr.msra.gmra.mxu3 %vm268_vm2, %v1624_v63  ;;  %1658 = vmatmul.msk.bf16.vlgmr.msra.gmra.mxu0 %vm268_vm2, %v1242_v0  ;;  %v828_v63 = vrot.slane %v826_v52, 5  ;;  %v838_v0 = vrot.slane %v837_v53, 4  ;;  %v1214_v52 = vshll.u32 %v1654_v43, 16  ;;  %v1225_v53 = vor.u32 %v1224_v39, %v1221_v38 }
  0x69   : > { %v829_v8 = vsel %vm1868_vm5, %v824_v62, %v828_v63  ;;  %v843_v9 = vsel %vm1868_vm5, %v838_v0, %v842_v1  ;;  %v1216_v60 = vrot.slane %v1214_v52, 5  ;;  %v1226_v61 = vrot.slane %v1225_v53, 4 }
  0x6a   : > { %v878_v22 = vunpack.c.l.b16 %v829_v8  ;;  %v879_v23 = vunpack.c.l.b16 %v843_v9  ;;  %v1230_v62 = vrot.slane %v1228_v54, 5  ;;  %v1688_v8 = vld [vmem:[%s1836_s5 + $0x84] sm:$0xf0] }
  0x6b   : > { %v1636_v14 = vor.u32 %v1688_v8, %v1635_v7 }
  0x6c   : > { %v884_v40 = vpack.c.b16 %v879_v23, %v878_v22  ;;  %v1231_v2 = vsel %vm1868_vm5, %v1226_v61, %v1230_v62 }
  0x6d   : > { %v1241_v10 = vunpack.c.l.b16 %v1231_v2 }
  0x74   : > { %1580 = vmatmul.msk.bf16.gmra.mxu1 %vm268_vm2, %v883_v48  ;;  %1609 = vmatmul.msk.bf16.gmra.mxu2 %vm268_vm2, %v1599_v55  ;;  %v868_v48 = vshll.u32 %v1577_v35, 16  ;;  %v852_v55 = vrot.slane %v851_v45, 4 }
  0x76   : > { %v870_v58 = vrot.slane %v868_v48, 5 }
  0x77   : > { %1638 = vmatmul.msk.bf16.gmra.mxu3 %vm268_vm2, %v1628_v56  ;;  %1659 = vmatmul.msk.bf16.gmra.mxu0 %vm268_vm2, %v1243_v59  ;;  %v856_v56 = vrot.slane %v854_v46, 5  ;;  %v1212_v59 = vrot.slane %v1211_v51, 4 }
  0x78   : > { %v871_v0 = vsel %vm1868_vm5, %v866_v57, %v870_v58 }
  0x79   : > { %v857_v63 = vsel %vm1868_vm5, %v852_v55, %v856_v56  ;;  %v1217_v1 = vsel %vm1868_vm5, %v1212_v59, %v1216_v60  ;;  %v881_v4 = vunpack.c.l.b16 %v871_v0 }
  0x7a   : > { %v880_v3 = vunpack.c.l.b16 %v857_v63  ;;  %v1240_v9 = vunpack.c.l.b16 %v1217_v1 }
  0x7c   : > { %v885_v11 = vpack.c.b16 %v881_v4, %v880_v3  ;;  %v1245_v15 = vpack.c.b16 %v1241_v10, %v1240_v9 }
  0x84   : > { %1581 = vmatmul.msk.bf16.gmra.mxu1 %vm268_vm2, %v884_v40  ;;  %1610 = vmatmul.msk.bf16.gmra.mxu2 %vm268_vm2, %v1603_v41 }
  0x87   : > { %1639 = vmatmul.msk.bf16.gmra.mxu3 %vm268_vm2, %v1632_v42  ;;  %1660 = vmatmul.msk.bf16.gmra.mxu0 %vm268_vm2, %v1244_v49 }
  0x91   : > { %v302_v12 = vpop.f32.mrf.mxu1 }
  0x94   : > { %v297_v16 = vpop.f32.mrf.mxu0  ;;  %1582 = vmatmul.msk.bf16.gmra.mxu1 %vm268_vm2, %v885_v11  ;;  %1611 = vmatmul.msk.bf16.gmra.mxu2 %vm268_vm2, %v1607_v13 }
  0x97   : > { %1640 = vmatmul.msk.bf16.gmra.mxu3 %vm268_vm2, %v1636_v14  ;;  %1661 = vmatmul.msk.bf16.gmra.mxu0 %vm268_vm2, %v1245_v15  ;;  %v307_v50 = vpop.f32.mrf.mxu2 }
  0x99   : > { %v2035_v18 = vpop.f32.mrf.mxu1 }
  0x9a   : > { %v312_v17 = vpop.f32.mrf.mxu3 }
  0x9c   : > { %v299_v19 = vpop.f32.mrf.mxu0 }
  0x9f   : > { %v2037_v20 = vpop.f32.mrf.mxu2 }
  0xa1   : > { %v361_v22 = vpop.f32.mrf.mxu1 }
  0xa2   : > { %v2039_v21 = vpop.f32.mrf.mxu3  ;;  %v362_v23 = vadd.f32 %v361_v22, %v297_v16 }
  0xa4   : > { %v716_v24 = vpop.f32.mrf.mxu0 }
  0xa7   : > { %v550_v25 = vpop.f32.mrf.mxu2 }
  0xa8   : > { %v570_v27 = vadd.f32 %v550_v25, %v362_v23 }
  0xa9   : > { %v363_v28 = vpop.f32.mrf.mxu1 }
  0xaa   : > { %v633_v26 = vpop.f32.mrf.mxu3  ;;  %v364_v8 = vadd.f32 %v363_v28, %v299_v19  ;;  %v2067_v19 = vld [vmem:[%s2112_s2] ss:$0 sm:$0xff] }
  0xab   : > { %v653_v29 = vadd.f32 %v633_v26, %v570_v27 }
  0xac   : > { %v718_v30 = vpop.f32.mrf.mxu0 }
  0xad   : > { %v736_v31 = vadd.f32 %v716_v24, %v653_v29 }
  0xaf   : > { %v552_v32 = vpop.f32.mrf.mxu2 }
  0xb0   : > { %v571_v10 = vadd.f32 %v552_v32, %v364_v8 }
  0xb1   : > { %v366_v34 = vpop.f32.mrf.mxu1 }
  0xb2   : > { %v635_v33 = vpop.f32.mrf.mxu3  ;;  %v367_v35 = vadd.f32 %v366_v34, %v302_v12 }
  0xb3   : > { %v654_v14 = vadd.f32 %v635_v33, %v571_v10 }
  0xb4   : > { %v721_v36 = vpop.f32.mrf.mxu0 }
  0xb5   : > { %v737_v22 = vadd.f32 %v718_v30, %v654_v14 }
  0xb7   : > { %v555_v37 = vpop.f32.mrf.mxu2 }
  0xb8   : > { %v572_v39 = vadd.f32 %v555_v37, %v367_v35 }
  0xb9   : > { %v368_v40 = vpop.f32.mrf.mxu1 }
  0xba   : > { %v638_v38 = vpop.f32.mrf.mxu3  ;;  %v369_v29 = vadd.f32 %v368_v40, %v2035_v18 }
  0xbb   : > { %v655_v41 = vadd.f32 %v638_v38, %v572_v39 }
  0xbc   : > { %v2041_v42 = vpop.f32.mrf.mxu0 }
  0xbd   : > { %v738_v43 = vadd.f32 %v721_v36, %v655_v41 }
  0xbf   : > { %v557_v44 = vpop.f32.mrf.mxu2 }
  0xc0   : > { %v573_v33 = vadd.f32 %v557_v44, %v369_v29 }
  0xc1   : > { %v371_v46 = vpop.f32.mrf.mxu1 }
  0xc2   : > { %v640_v45 = vpop.f32.mrf.mxu3  ;;  %v372_v47 = vadd.f32 %v371_v46, %v307_v50 }
  0xc3   : > { %v656_v39 = vadd.f32 %v640_v45, %v573_v33 }
  0xc4   : > { %v726_v48 = vpop.f32.mrf.mxu0 }
  0xc7   : > { %v560_v49 = vpop.f32.mrf.mxu2 }
  0xc8   : > { %v574_v52 = vadd.f32 %v560_v49, %v372_v47  ;;  %v739_v49 = vadd.f32 %v2041_v42, %v656_v39 }
  0xc9   : > { %v2043_v53 = vpop.f32.mrf.mxu1 }
  0xca   : > { %v643_v51 = vpop.f32.mrf.mxu3 }
  0xcb   : > { %v657_v54 = vadd.f32 %v643_v51, %v574_v52 }
  0xcc   : > { %v2045_v55 = vpop.f32.mrf.mxu0 }
  0xcd   : > { %v2047_v56 = vadd.f32 %v726_v48, %v657_v54 }
  0xcf   : > { %v2049_v57 = vpop.f32.mrf.mxu2 }
  0xd1   : > { %v376_v59 = vpop.f32.mrf.mxu1 }
  0xd2   : > { %v2051_v58 = vpop.f32.mrf.mxu3  ;;  %v377_v60 = vadd.f32 %v376_v59, %v312_v17 }
  0xd4   : > { %v731_v61 = vpop.f32.mrf.mxu0 }
  0xd7   : > { %v565_v62 = vpop.f32.mrf.mxu2 }
  0xd8   : > { %v576_v0 = vadd.f32 %v565_v62, %v377_v60  ;;  %v374_v60 = vadd.f32 %v2043_v53, %v2037_v20 }
  0xd9   : > { %v2053_v1 = vpop.f32.mrf.mxu1 }
  0xda   : > { %v648_v63 = vpop.f32.mrf.mxu3  ;;  %v575_v62 = vadd.f32 %v2049_v57, %v374_v60 }
  0xdb   : > { %v659_v2 = vadd.f32 %v648_v63, %v576_v0 }
  0xdc   : > { %v2055_v3 = vpop.f32.mrf.mxu0  ;;  %v658_v10 = vadd.f32 %v2051_v58, %v575_v62 }
  0xdd   : > { %v2057_v4 = vadd.f32 %v731_v61, %v659_v2 }
  0xde   : > { %v741_v57 = vadd.f32 %v2045_v55, %v658_v10 }
  0xdf   : > { %v2059_v5 = vpop.f32.mrf.mxu2 }
  0xe1   : > { %v910_v7 = vpop.f32.mrf.mxu1 }
  0xe2   : > { %v2061_v6 = vpop.f32.mrf.mxu3  ;;  %v930_v11 = vadd.f32 %v910_v7, %v736_v31 }
  0xe4   : > { %v1270_v9 = vpop.f32.mrf.mxu0 }
  0xe7   : > { %v993_v12 = vpop.f32.mrf.mxu2 }
  0xe8   : > { %v1013_v15 = vadd.f32 %v993_v12, %v930_v11 }
  0xe9   : > { %v912_v16 = vpop.f32.mrf.mxu1 }
  0xea   : > { %v1076_v13 = vpop.f32.mrf.mxu3  ;;  %v931_v23 = vadd.f32 %v912_v16, %v737_v22 }
  0xeb   : > { %v1096_v17 = vadd.f32 %v1076_v13, %v1013_v15 }
  0xec   : > { %v1272_v50 = vpop.f32.mrf.mxu0 }
  0xed   : > { %v1290_v26 = vadd.f32 %v1270_v9, %v1096_v17 }
  0xef   : > { %v995_v24 = vpop.f32.mrf.mxu2  ;;  %v1302_v30 = vadd.f32 %v2067_v19, %v1290_v26 }
  0xf0   : > { %v1014_v27 = vadd.f32 %v995_v24, %v931_v23  ;;  %v379_v24 = vadd.f32 %v2053_v1, %v2039_v21 }
  0xf1   : > { %v915_v28 = vpop.f32.mrf.mxu1  ;;  %v1310_v41 = vmax.f32 %v1302_v30, 0.0 }
  0xf2   : > { %v1078_v25 = vpop.f32.mrf.mxu3  ;;  %v932_v36 = vadd.f32 %v915_v28, %v738_v43 }
  0xf3   : > { %v1097_v31 = vadd.f32 %v1078_v25, %v1014_v27  ;;  %v577_v25 = vadd.f32 %v2059_v5, %v379_v24 }
  0xf4   : > { %v1275_v32 = vpop.f32.mrf.mxu0 }
  0xf5   : > { %v1291_v34 = vadd.f32 %v1272_v50, %v1097_v31 }
  0xf7   : > { %v1303_v35 = vadd.f32 %v2067_v19, %v1291_v34  ;;  %v998_v37 = vpop.f32.mrf.mxu2 }
  0xf8   : > { %v1015_v47 = vadd.f32 %v998_v37, %v932_v36 }
  0xf9   : > { %v1311_v46 = vmax.f32 %v1303_v35, 0.0  ;;  %v917_v48 = vpop.f32.mrf.mxu1 }
  0xfa   : > { %v1081_v38 = vpop.f32.mrf.mxu3  ;;  %v933_v43 = vadd.f32 %v917_v48, %v739_v49 }
  0xfb   : > { %v1692_v18 = vpack.c.bf16 %v1311_v46, %v1310_v41  ;;  %v1098_v44 = vadd.f32 %v1081_v38, %v1015_v47 }
  0xfc   : > { %v1277_v40 = vpop.f32.mrf.mxu0 }
  0xfd   : > { %1693 = vst [vmem:[%s2076_s21] sm:$0xff] %v1692_v18   ;;  %v1292_v45 = vadd.f32 %v1275_v32, %v1098_v44  ;;  %v660_v32 = vadd.f32 %v2061_v6, %v577_v25 }
  0xff   : > { %v1000_v51 = vpop.f32.mrf.mxu2  ;;  %v1304_v63 = vadd.f32 %v2067_v19, %v1292_v45  ;;  %v743_v36 = vadd.f32 %v2055_v3, %v660_v32 }
 0x100   : > { %v1016_v54 = vadd.f32 %v1000_v51, %v933_v43 }
 0x101   : > { %v920_v59 = vpop.f32.mrf.mxu1  ;;  %v1312_v11 = vmax.f32 %v1304_v63, 0.0 }
 0x102   : > { %v1083_v52 = vpop.f32.mrf.mxu3  ;;  %v934_v42 = vadd.f32 %v920_v59, %v2047_v56 }
 0x103   : > { %v1099_v61 = vadd.f32 %v1083_v52, %v1016_v54 }
 0x104   : > { %v1280_v2 = vpop.f32.mrf.mxu0 }
 0x105   : > { %v1293_v0 = vadd.f32 %v1277_v40, %v1099_v61 }
 0x107   : > { %v1305_v7 = vadd.f32 %v2067_v19, %v1293_v0  ;;  %v1003_v8 = vpop.f32.mrf.mxu2 }
 0x108   : > { %v1017_v13 = vadd.f32 %v1003_v8, %v934_v42 }
 0x109   : > { %v1313_v12 = vmax.f32 %v1305_v7, 0.0  ;;  %v922_v20 = vpop.f32.mrf.mxu1 }
 0x10a   : > { %v1086_v9 = vpop.f32.mrf.mxu3  ;;  %v935_v15 = vadd.f32 %v922_v20, %v741_v57 }
 0x10b   : > { %v1697_v53 = vpack.c.bf16 %v1313_v12, %v1312_v11  ;;  %v1100_v14 = vadd.f32 %v1086_v9, %v1017_v13 }
 0x10c   : > { %v1282_v16 = vpop.f32.mrf.mxu0 }
 0x10d   : > { %1709 = vst [vmem:[%s2076_s21 + $0x8] sm:$0xff] %v1697_v53   ;;  %v1294_v22 = vadd.f32 %v1280_v2, %v1100_v14 }
 0x10f   : > { %v1005_v50 = vpop.f32.mrf.mxu2  ;;  %v1306_v26 = vadd.f32 %v2067_v19, %v1294_v22 }
 0x110   : > { %v1018_v23 = vadd.f32 %v1005_v50, %v935_v15 }
 0x111   : > { %v925_v56 = vpop.f32.mrf.mxu1  ;;  %v1314_v33 = vmax.f32 %v1306_v26, 0.0 }
 0x112   : > { %v1088_v17 = vpop.f32.mrf.mxu3  ;;  %v936_v55 = vadd.f32 %v925_v56, %v2057_v4 }
 0x113   : > { %v1101_v58 = vadd.f32 %v1088_v17, %v1018_v23 }
 0x114   : > { %v1285_v35 = vpop.f32.mrf.mxu0 }
 0x115   : > { %v1295_v27 = vadd.f32 %v1282_v16, %v1101_v58 }
 0x117   : > { %v1307_v28 = vadd.f32 %v2067_v19, %v1295_v27  ;;  %v1008_v29 = vpop.f32.mrf.mxu2 }
 0x118   : > { %v1019_v34 = vadd.f32 %v1008_v29, %v936_v55 }
 0x119   : > { %v1315_v30 = vmax.f32 %v1307_v28, 0.0  ;;  %v927_v1 = vpop.f32.mrf.mxu1 }
 0x11a   : > { %v1091_v31 = vpop.f32.mrf.mxu3  ;;  %v937_v37 = vadd.f32 %v927_v1, %v743_v36 }
 0x11b   : > { %v1702_v21 = vpack.c.bf16 %v1315_v30, %v1314_v33  ;;  %v1102_v5 = vadd.f32 %v1091_v31, %v1019_v34 }
 0x11c   : > { %v1287_v47 = vpop.f32.mrf.mxu0 }
 0x11d   : > { %1710 = vst [vmem:[%s2076_s21 + $0x10] sm:$0xff] %v1702_v21   ;;  %v1296_v39 = vadd.f32 %v1285_v35, %v1102_v5 }
 0x11f   : > { %v1010_v38 = vpop.f32.mrf.mxu2  ;;  %v1308_v6 = vadd.f32 %v2067_v19, %v1296_v39 }
 0x120   : > { %v1020_v41 = vadd.f32 %v1010_v38, %v937_v37 }
 0x121   : > { %v1316_v40 = vmax.f32 %v1308_v6, 0.0 }
 0x122   : > { %v1093_v4 = vpop.f32.mrf.mxu3 }
 0x123   : > { %v1103_v46 = vadd.f32 %v1093_v4, %v1020_v41 }
 0x125   : > { %v1297_v48 = vadd.f32 %v1287_v47, %v1103_v46 }
 0x127   : > { %v1309_v18 = vadd.f32 %v2067_v19, %v1297_v48 }
 0x129   : > { %v1317_v44 = vmax.f32 %v1309_v18, 0.0 }
 0x12b   : > { %v1707_v49 = vpack.c.bf16 %v1317_v44, %v1316_v40 }
 0x12d   : > { %1711 = vst [vmem:[%s2076_s21 + $0x18] sm:$0xff] %v1707_v49  }
 0x12e PF: > { %s13_s14 = sadd.s32 1, %s1764_s14   ;;  %s2116_s12 = smov %s1760_s13 }
 0x12f   : > { %p10_p6 = scmp.ge.s32.totalorder %s13_s14, 4   ;;  %s2117_s13 = smov %s2119_s15 }
 0x131   :  { %12 = sbr.rel (!%p10_p6) target bundleno = 2 (0x2), region = 81 }

// kernel: concat_model_forward.4
= control target key start
LH: loop header
LB: loop body
LE: loop exit
PB: predicated region body
PF: predicated region fallthrough
CT: control target
= control target key end

     0   :  { %s1181_s12 = smov 0   ;;  %s1183_s13 = smov 0   ;;  %s1364_s0 = inlined_call_operand.vmem [shape: bf16[8,5,5,16], index: 0, kind: input, shape index: {}]   ;;  %s1365_s1 = inlined_call_operand.vmem [shape: bf16[9,16,128], index: 1, kind: input, shape index: {}]   ;;  %s1366_s2 = inlined_call_operand.vmem [shape: f32[1,128], index: 2, kind: input, shape index: {}]   ;;  %s1367_s3 = inlined_call_operand.vmem [shape: bf16[2,16,128], index: 3, kind: output, shape index: {}]  }
   0x1   :  { %s1185_s14 = smov 0  }
   0x2 LB: > { %s25_s15 = sadd.s32 1, %s1155_s13  ;;  %p1000_p0 = scmp.ge.s32.totalorder %s1159_s14, 1  ;;  %s1159_s14 = sphi %s1185_s14, %s13_s14   ;;  %s1155_s13 = sphi %s1183_s13, %s1375_s13   ;;  %s1151_s12 = sphi %s1181_s12, %s1374_s12  }
   0x3   : > { %p27_p1 = scmp.ge.s32.totalorder %s25_s15, 2  ;;  %p170_p2 = scmp.lt.s32.totalorder %s1159_s14, 3 }
   0x5   : > { %s1377_s15 = smov (%p27_p1, %s25_s15), 0  ;;  %p171_p3 = pnand %p1000_p0, %p170_p2 }
   0x6   : > { %s1001_s18 = sshll.u32 (!%p171_p3), %s1151_s12, 2  ;;  %p219_p5 = scmp.lt.s32.totalorder (!%p171_p3), %s1151_s12, 1 }
   0x7   : > { %174 = sbr.rel (%p171_p3) target bundleno = 259 (0x103), region = 32  ;;  %p206_p4 = scmp.lt.s32.totalorder (!%p171_p3), %s1001_s18, 7 }
   0xc   : > { %v1098_v0 = vld [vmem:[%s1365_s1 + $0x8] sm:$0xff]  ;;  %v1099_v1 = vld [vmem:[%s1365_s1 + $0x10] sm:$0xff]  ;;  %s1379_s18 = smov (!%p206_p4, %s1001_s18), 7  ;;  %vm260_vm0 = vcmask 130048   ;;  %vm323_vm1 = vcmask 1041408   ;;  %vm327_vm2 = vcmask 1043458  }
   0xd   : > { %270 = vmatpush.bf16.msra.mxu0 %v1098_v0  ;;  %438 = vmatpush.bf16.msra.mxu2 %v1099_v1  ;;  %s1111_s21 = smul.u32 20, %s1379_s18  ;;  %vm349_vm3 = vsmask.f32 1280  ;;  %v1097_v13 = vld [vmem:[%s1365_s1] sm:$0xff]  ;;  %vm350_vm4 = vsmask.f32 3336 }
   0xe   : > { %vm352_vm5 = vsmask.f32 5392  ;;  %v1100_v15 = vld [vmem:[%s1365_s1 + $0x18] sm:$0xff]  ;;  %304 = vmatpush.bf16.msra.mxu1 %v1097_v13  ;;  %vm354_vm6 = vsmask.f32 7448  ;;  %vm1241_vm7 = vmor %vm349_vm3, %vm350_vm4  ;;  %v1101_v52 = vld [vmem:[%s1365_s1 + $0x20] sm:$0xff] }
   0xf   : > { %s1211_s24 = scalar_lea.vmem %s1364_s0, %s1111_s21  ;;  %482 = vmatpush.bf16.msra.mxu3 %v1100_v15  ;;  %vm1249_vm8 = vmor %vm1241_vm7, %vm352_vm5  ;;  %v1103_v15 = vld [vmem:[%s1365_s1 + $0x30] sm:$0xff]  ;;  %s1381_s12 = smov (!%p219_p5, %s1151_s12), 1 }
  0x10   : > { %v1005_v2 = vld [vmem:[%s1211_s24 + $0x14] sm:$0x3]  ;;  %v1006_v3 = vld [vmem:[%s1211_s24 + $0x18] sm:$0x3]  ;;  %v1007_v4 = vld [vmem:[%s1211_s24 + $0x1c] sm:$0x3] }
  0x11   : > { %v1008_v5 = vld [vmem:[%s1211_s24 + $0x20] sm:$0x3]  ;;  %243 = vst [vmem:[#allocation1] ss:$4 sm:$0xff] %v1005_v2  ;;  %v312_v7 = vld [vmem:[%s1211_s24 + $0x4] sm:$0x7]  ;;  %526 = vmatpush.bf16.msrb.mxu0 %v1101_v52  ;;  %vm1259_vm9 = vmor %vm1249_vm8, %vm354_vm6  ;;  %697 = vmatpush.bf16.msrb.mxu2 %v1103_v15 }
  0x12   : > { %246 = vst [vmem:[#allocation1 + $0x1] ss:$4 sm:$0xff] %v1006_v3  ;;  %v311_v6 = vld [vmem:[%s1211_s24] sm:$0x7]  ;;  %v313_v8 = vld [vmem:[%s1211_s24 + $0x8] sm:$0x7] }
  0x13   : > { %249 = vst [vmem:[#allocation1 + $0x2] ss:$4 sm:$0xff] %v1007_v4  ;;  %v314_v9 = vld [vmem:[%s1211_s24 + $0xc] sm:$0x7]  ;;  %v319_v10 = vrot.slane %v311_v6, 2  ;;  %v320_v11 = vrot.slane %v312_v7, 2 }
  0x14   : > { %252 = vst [vmem:[#allocation1 + $0x3] ss:$4 sm:$0xff] %v1008_v5  ;;  %v321_v12 = vrot.slane %v313_v8, 2  ;;  %v322_v14 = vrot.slane %v314_v9, 2  ;;  %v228_v23 = vld [vmem:[%s1211_s24] sm:$0x3] }
  0x15   : > { %v326_v16 = vsel %vm323_vm1, %v311_v6, %v319_v10  ;;  %v328_v17 = vsel %vm327_vm2, %v311_v6, %v319_v10  ;;  %v333_v18 = vsel %vm323_vm1, %v312_v7, %v320_v11  ;;  %v334_v19 = vsel %vm327_vm2, %v312_v7, %v320_v11  ;;  %v229_v24 = vld [vmem:[%s1211_s24 + $0x4] sm:$0x3]  ;;  %v230_v29 = vld [vmem:[%s1211_s24 + $0x8] sm:$0x3]  ;;  %v231_v30 = vld [vmem:[%s1211_s24 + $0xc] sm:$0x3] }
  0x16   : > { %v330_v20 = vrot.slane %v328_v17, 2  ;;  %v336_v21 = vrot.slane %v334_v19, 2  ;;  %v340_v22 = vsel %vm327_vm2, %v313_v8, %v321_v12  ;;  %v339_v25 = vsel %vm323_vm1, %v313_v8, %v321_v12  ;;  %v1050_v6 = vld [vmem:[%s1211_s24 + $0x28] sm:$0x7]  ;;  %v1051_v8 = vld [vmem:[%s1211_s24 + $0x2c] sm:$0x7] }
  0x17   : > { %v342_v26 = vrot.slane %v340_v22, 2  ;;  %v346_v27 = vsel %vm327_vm2, %v314_v9, %v322_v14  ;;  %v356_v28 = vshrl.u32 %v326_v16, 16  ;;  %v359_v31 = vshll.u32 %v326_v16, 16  ;;  %v1052_v11 = vld [vmem:[%s1211_s24 + $0x30] sm:$0x7]  ;;  %s1096_s18 = sshll.u32 %s1381_s12, 3 }
  0x18   : > { %v369_v32 = vshrl.u32 %v333_v18, 16  ;;  %v345_v34 = vsel %vm323_vm1, %v314_v9, %v322_v14  ;;  %v348_v35 = vrot.slane %v346_v27, 2  ;;  %v372_v38 = vshll.u32 %v333_v18, 16  ;;  %v1102_v14 = vld [vmem:[%s1365_s1 + $0x28] sm:$0xff]  ;;  %v1053_v18 = vld [vmem:[%s1211_s24 + $0x34] sm:$0x7]  ;;  %s226_s21 = scalar_lea.vmem %s1367_s3, %s1096_s18 }
  0x19   : > { %v358_v37 = vrot.slane %v356_v28, 6  ;;  %v361_v39 = vrot.slane %v359_v31, 7  ;;  %v365_v40 = vshll.u32 %v330_v20, 16  ;;  %v382_v42 = vshrl.u32 %v339_v25, 16  ;;  %653 = vmatpush.bf16.msrb.mxu1 %v1102_v14  ;;  %v1029_v31 = vld [vmem:[%s1211_s24 + $0x2c] sm:$0x3] }
  0x1a   : > { %v371_v41 = vrot.slane %v369_v32, 6  ;;  %v374_v43 = vrot.slane %v372_v38, 7  ;;  %v378_v44 = vshll.u32 %v336_v21, 16  ;;  %v385_v45 = vshll.u32 %v339_v25, 16  ;;  %v1030_v32 = vld [vmem:[%s1211_s24 + $0x30] sm:$0x3] }
  0x1b   : > { %v253_v33 = vld.sshfl [vmem:[#allocation1] sm:$0xff pattern:$0x73625140]  ;;  %v391_v46 = vshll.u32 %v342_v26, 16  ;;  %v362_v48 = vor.u32 %v361_v39, %v358_v37  ;;  %v384_v49 = vrot.slane %v382_v42, 6  ;;  %v395_v50 = vshrl.u32 %v345_v34, 16 }
  0x1c   : > { %1015 = vmatmul.msk.bf16.vlgmr.msra.gmra.mxu0 %vm260_vm0, %v253_v33  ;;  %278 = vst [vmem:[#allocation1] ss:$4 sm:$0xff] %v228_v23  ;;  %v398_v51 = vshll.u32 %v345_v34, 16  ;;  %v375_v53 = vor.u32 %v374_v43, %v371_v41  ;;  %v387_v54 = vrot.slane %v385_v45, 7  ;;  %v404_v55 = vshll.u32 %v348_v35, 16  ;;  %v1104_v45 = vld [vmem:[%s1365_s1 + $0x38] sm:$0xff] }
  0x1d   : > { %281 = vst [vmem:[#allocation1 + $0x1] ss:$4 sm:$0xff] %v229_v24  ;;  %v363_v56 = vrot.slane %v362_v48, 2  ;;  %v367_v57 = vrot.slane %v365_v40, 7  ;;  %v397_v58 = vrot.slane %v395_v50, 6  ;;  %v380_v62 = vrot.slane %v378_v44, 7  ;;  %741 = vmatpush.bf16.msrb.mxu3 %v1104_v45 }
  0x1e   : > { %284 = vst [vmem:[#allocation1 + $0x2] ss:$4 sm:$0xff] %v230_v29  ;;  %v400_v59 = vrot.slane %v398_v51, 7  ;;  %v376_v61 = vrot.slane %v375_v53, 2  ;;  %v388_v63 = vor.u32 %v387_v54, %v384_v49  ;;  %v393_v0 = vrot.slane %v391_v46, 7 }
  0x1f   : > { %287 = vst [vmem:[#allocation1 + $0x3] ss:$4 sm:$0xff] %v231_v30  ;;  %v406_v3 = vrot.slane %v404_v55, 7  ;;  %v368_v4 = vsel %vm1259_vm9, %v363_v56, %v367_v57  ;;  %v543_v13 = vrot.slane %v1050_v6, 2  ;;  %v544_v16 = vrot.slane %v1051_v8, 2 }
  0x20   : > { %v401_v1 = vor.u32 %v400_v59, %v397_v58  ;;  %v389_v2 = vrot.slane %v388_v63, 2  ;;  %v381_v7 = vsel %vm1259_vm9, %v376_v61, %v380_v62  ;;  %v545_v17 = vrot.slane %v1052_v11, 2  ;;  %v1028_v26 = vld [vmem:[%s1211_s24 + $0x28] sm:$0x3]  ;;  %v1031_v36 = vld [vmem:[%s1211_s24 + $0x34] sm:$0x3] }
  0x21   : > { %v549_v19 = vsel %vm323_vm1, %v1050_v6, %v543_v13  ;;  %v555_v20 = vsel %vm323_vm1, %v1051_v8, %v544_v16  ;;  %v546_v22 = vrot.slane %v1053_v18, 2  ;;  %v550_v23 = vsel %vm327_vm2, %v1050_v6, %v543_v13  ;;  %v1039_v58 = vld [vmem:[%s1211_s24 + $0x3c] sm:$0x3]  ;;  %v1040_v59 = vld [vmem:[%s1211_s24 + $0x40] sm:$0x3] }
  0x22   : > { %v402_v5 = vrot.slane %v401_v1, 2  ;;  %v394_v10 = vsel %vm1259_vm9, %v389_v2, %v393_v0  ;;  %v561_v21 = vsel %vm323_vm1, %v1052_v11, %v545_v17  ;;  %v556_v24 = vsel %vm327_vm2, %v1051_v8, %v544_v16  ;;  %v1041_v1 = vld [vmem:[%s1211_s24 + $0x44] sm:$0x3]  ;;  %v1084_v15 = vld [vmem:[%s1211_s24 + $0x8] sm:$0x7] }
  0x23   : > { %v571_v25 = vshrl.u32 %v549_v19, 16  ;;  %v562_v27 = vsel %vm327_vm2, %v1052_v11, %v545_v17  ;;  %v574_v28 = vshll.u32 %v549_v19, 16  ;;  %v584_v29 = vshrl.u32 %v555_v20, 16  ;;  %v1083_v8 = vld [vmem:[%s1211_s24 + $0x4] sm:$0x7] }
  0x24   : > { %v407_v12 = vsel %vm1259_vm9, %v402_v5, %v406_v3  ;;  %v587_v30 = vshll.u32 %v555_v20, 16  ;;  %v597_v33 = vshrl.u32 %v561_v21, 16  ;;  %v600_v34 = vshll.u32 %v561_v21, 16  ;;  %v1105_v11 = vld [vmem:[%s1365_s1 + $0x40] sm:$0xff]  ;;  %v1086_v19 = vld [vmem:[%s1211_s24 + $0x10] sm:$0x7] }
  0x25   : > { %v552_v37 = vrot.slane %v550_v23, 2  ;;  %v558_v38 = vrot.slane %v556_v24, 2  ;;  %v564_v39 = vrot.slane %v562_v27, 2  ;;  %v573_v40 = vrot.slane %v571_v25, 6  ;;  %868 = vmatpush.bf16.msra.mxu0 %v1105_v11  ;;  %v1062_v11 = vld [vmem:[%s1211_s24 + $0x8] sm:$0x3] }
  0x26   : > { %v288_v9 = vld.sshfl [vmem:[#allocation1] sm:$0xff pattern:$0x73625140]  ;;  %v567_v41 = vsel %vm323_vm1, %v1053_v18, %v546_v22  ;;  %v576_v42 = vrot.slane %v574_v28, 7  ;;  %v586_v43 = vrot.slane %v584_v29, 6  ;;  %v589_v44 = vrot.slane %v587_v30, 7 }
  0x27   : > { %412 = vst [vmem:[#allocation1] ss:$4 sm:$0xff] %v368_v4  ;;  %1020 = vmatmul.msk.bf16.vlgmr.msra.gmra.mxu1 %vm260_vm0, %v288_v9  ;;  %v568_v46 = vsel %vm327_vm2, %v1053_v18, %v546_v22  ;;  %v599_v47 = vrot.slane %v597_v33, 6  ;;  %v602_v48 = vrot.slane %v600_v34, 7  ;;  %v580_v49 = vshll.u32 %v552_v37, 16 }
  0x28   : > { %415 = vst [vmem:[#allocation1 + $0x1] ss:$4 sm:$0xff] %v381_v7  ;;  %v593_v50 = vshll.u32 %v558_v38, 16  ;;  %v610_v51 = vshrl.u32 %v567_v41, 16  ;;  %v613_v52 = vshll.u32 %v567_v41, 16  ;;  %v570_v53 = vrot.slane %v568_v46, 2 }
  0x29   : > { %418 = vst [vmem:[#allocation1 + $0x2] ss:$4 sm:$0xff] %v394_v10  ;;  %v577_v54 = vor.u32 %v576_v42, %v573_v40  ;;  %v590_v55 = vor.u32 %v589_v44, %v586_v43  ;;  %v606_v56 = vshll.u32 %v564_v39, 16  ;;  %v603_v57 = vor.u32 %v602_v48, %v599_v47  ;;  %v1042_v9 = vld [vmem:[%s1211_s24 + $0x48] sm:$0x3] }
  0x2a   : > { %421 = vst [vmem:[#allocation1 + $0x3] ss:$4 sm:$0xff] %v407_v12  ;;  %v582_v61 = vrot.slane %v580_v49, 7  ;;  %v595_v62 = vrot.slane %v593_v50, 7  ;;  %v612_v63 = vrot.slane %v610_v51, 6  ;;  %v615_v0 = vrot.slane %v613_v52, 7 }
  0x2b   : > { %v578_v2 = vrot.slane %v577_v54, 2  ;;  %v591_v3 = vrot.slane %v590_v55, 2  ;;  %v608_v4 = vrot.slane %v606_v56, 7  ;;  %v619_v5 = vshll.u32 %v570_v53, 16  ;;  %v1085_v18 = vld [vmem:[%s1211_s24 + $0xc] sm:$0x7] }
  0x2c   : > { %v604_v7 = vrot.slane %v603_v57, 2  ;;  %v616_v10 = vor.u32 %v615_v0, %v612_v63  ;;  %v758_v12 = vrot.slane %v1083_v8, 2  ;;  %v759_v21 = vrot.slane %v1084_v15, 2 }
  0x2d   : > { %v583_v13 = vsel %vm1259_vm9, %v578_v2, %v582_v61  ;;  %v621_v14 = vrot.slane %v619_v5, 7  ;;  %v596_v16 = vsel %vm1259_vm9, %v591_v3, %v595_v62  ;;  %v760_v22 = vrot.slane %v1085_v18, 2 }
  0x2e   : > { %v609_v17 = vsel %vm1259_vm9, %v604_v7, %v608_v4  ;;  %v764_v20 = vsel %vm323_vm1, %v1083_v8, %v758_v12  ;;  %v761_v23 = vrot.slane %v1086_v19, 2  ;;  %v765_v24 = vsel %vm327_vm2, %v1083_v8, %v758_v12 }
  0x2f   : > { %v617_v25 = vrot.slane %v616_v10, 2  ;;  %v786_v27 = vshrl.u32 %v764_v20, 16  ;;  %v789_v28 = vshll.u32 %v764_v20, 16  ;;  %v770_v29 = vsel %vm323_vm1, %v1084_v15, %v759_v21  ;;  %v1075_v20 = vld [vmem:[%s1211_s24 + $0x24] sm:$0x3] }
  0x30   : > { %v771_v30 = vsel %vm327_vm2, %v1084_v15, %v759_v21  ;;  %v799_v41 = vshrl.u32 %v770_v29, 16  ;;  %v802_v42 = vshll.u32 %v770_v29, 16  ;;  %v1064_v15 = vld [vmem:[%s1211_s24 + $0x10] sm:$0x3] }
  0x31   : > { %v422_v35 = vld.sshfl [vmem:[#allocation1] sm:$0xff pattern:$0x73625140]  ;;  %v773_v33 = vrot.slane %v771_v30, 2  ;;  %v788_v38 = vrot.slane %v786_v27, 6  ;;  %v791_v39 = vrot.slane %v789_v28, 7  ;;  %v622_v50 = vsel %vm1259_vm9, %v617_v25, %v621_v14 }
  0x32   : > { %1027 = vmatmul.msk.bf16.vlgmr.msra.gmra.mxu2 %vm260_vm0, %v422_v35  ;;  %456 = vst [vmem:[#allocation1] ss:$4 sm:$0xff] %v1028_v26  ;;  %v767_v26 = vrot.slane %v765_v24, 2  ;;  %v782_v35 = vsel %vm323_vm1, %v1086_v19, %v761_v23  ;;  %v801_v51 = vrot.slane %v799_v41, 6  ;;  %v804_v52 = vrot.slane %v802_v42, 7 }
  0x33   : > { %459 = vst [vmem:[#allocation1 + $0x1] ss:$4 sm:$0xff] %v1029_v31  ;;  %v776_v31 = vsel %vm323_vm1, %v1085_v18, %v760_v22  ;;  %v808_v43 = vshll.u32 %v773_v33, 16  ;;  %v792_v46 = vor.u32 %v791_v39, %v788_v38  ;;  %v825_v56 = vshrl.u32 %v782_v35, 16 }
  0x34   : > { %462 = vst [vmem:[#allocation1 + $0x2] ss:$4 sm:$0xff] %v1030_v32  ;;  %v777_v32 = vsel %vm327_vm2, %v1085_v18, %v760_v22  ;;  %v795_v40 = vshll.u32 %v767_v26, 16  ;;  %v812_v44 = vshrl.u32 %v776_v31, 16  ;;  %v815_v48 = vshll.u32 %v776_v31, 16 }
  0x35   : > { %465 = vst [vmem:[#allocation1 + $0x3] ss:$4 sm:$0xff] %v1031_v36  ;;  %v779_v34 = vrot.slane %v777_v32, 2  ;;  %v783_v36 = vsel %vm327_vm2, %v1086_v19, %v761_v23  ;;  %v793_v54 = vrot.slane %v792_v46, 2  ;;  %v805_v57 = vor.u32 %v804_v52, %v801_v51  ;;  %v1074_v19 = vld [vmem:[%s1211_s24 + $0x20] sm:$0x3] }
  0x36   : > { %v785_v37 = vrot.slane %v783_v36, 2  ;;  %v797_v47 = vrot.slane %v795_v40, 7  ;;  %v814_v53 = vrot.slane %v812_v44, 6  ;;  %v817_v55 = vrot.slane %v815_v48, 7 }
  0x37   : > { %v821_v49 = vshll.u32 %v779_v34, 16  ;;  %v806_v2 = vrot.slane %v805_v57, 2 }
  0x38   : > { %v834_v61 = vshll.u32 %v785_v37, 16  ;;  %v798_v62 = vsel %vm1259_vm9, %v793_v54, %v797_v47  ;;  %v818_v63 = vor.u32 %v817_v55, %v814_v53  ;;  %v1136_v53 = vld [vmem:[%s1366_s2] ss:$0 sm:$0xff] }
  0x39   : > { %v823_v0 = vrot.slane %v821_v49, 7 }
  0x3a   : > { %v819_v4 = vrot.slane %v818_v63, 2  ;;  %v836_v7 = vrot.slane %v834_v61, 7 }
  0x3c   : > { %v466_v6 = vld.sshfl [vmem:[#allocation1] sm:$0xff pattern:$0x73625140]  ;;  %v824_v8 = vsel %vm1259_vm9, %v819_v4, %v823_v0 }
  0x3d   : > { %1038 = vmatmul.msk.bf16.vlgmr.msra.gmra.mxu3 %vm260_vm0, %v466_v6  ;;  %500 = vst [vmem:[#allocation1] ss:$4 sm:$0xff] %v1039_v58  ;;  %v810_v58 = vrot.slane %v808_v43, 7 }
  0x3e   : > { %503 = vst [vmem:[#allocation1 + $0x1] ss:$4 sm:$0xff] %v1040_v59  ;;  %v828_v59 = vshll.u32 %v782_v35, 16 }
  0x3f   : > { %506 = vst [vmem:[#allocation1 + $0x2] ss:$4 sm:$0xff] %v1041_v1  ;;  %v827_v1 = vrot.slane %v825_v56, 6  ;;  %v811_v5 = vsel %vm1259_vm9, %v806_v2, %v810_v58 }
  0x40   : > { %509 = vst [vmem:[#allocation1 + $0x3] ss:$4 sm:$0xff] %v1042_v9  ;;  %v830_v3 = vrot.slane %v828_v59, 7  ;;  %v1061_v9 = vld [vmem:[%s1211_s24 + $0x4] sm:$0x3] }
  0x42   : > { %v831_v6 = vor.u32 %v830_v3, %v827_v1 }
  0x44   : > { %v832_v10 = vrot.slane %v831_v6, 2 }
  0x46   : > { %v837_v14 = vsel %vm1259_vm9, %v832_v10, %v836_v7 }
  0x47   : > { %v510_v45 = vld.sshfl [vmem:[#allocation1] sm:$0xff pattern:$0x73625140] }
  0x48   : > { %1049 = vmatmul.msk.bf16.vlgmr.msrb.gmra.mxu0 %vm260_vm0, %v510_v45  ;;  %627 = vst [vmem:[#allocation1] ss:$4 sm:$0xff] %v583_v13  ;;  %v1063_v13 = vld [vmem:[%s1211_s24 + $0xc] sm:$0x3] }
  0x49   : > { %630 = vst [vmem:[#allocation1 + $0x1] ss:$4 sm:$0xff] %v596_v16  ;;  %v1072_v16 = vld [vmem:[%s1211_s24 + $0x18] sm:$0x3] }
  0x4a   : > { %633 = vst [vmem:[#allocation1 + $0x2] ss:$4 sm:$0xff] %v609_v17  ;;  %v1073_v17 = vld [vmem:[%s1211_s24 + $0x1c] sm:$0x3] }
  0x4b   : > { %636 = vst [vmem:[#allocation1 + $0x3] ss:$4 sm:$0xff] %v622_v50 }
  0x52   : > { %v637_v12 = vld.sshfl [vmem:[#allocation1] sm:$0xff pattern:$0x73625140] }
  0x53   : > { %1060 = vmatmul.msk.bf16.vlgmr.msrb.gmra.mxu1 %vm260_vm0, %v637_v12  ;;  %671 = vst [vmem:[#allocation1] ss:$4 sm:$0xff] %v1061_v9 }
  0x54   : > { %674 = vst [vmem:[#allocation1 + $0x1] ss:$4 sm:$0xff] %v1062_v11 }
  0x55   : > { %677 = vst [vmem:[#allocation1 + $0x2] ss:$4 sm:$0xff] %v1063_v13 }
  0x56   : > { %680 = vst [vmem:[#allocation1 + $0x3] ss:$4 sm:$0xff] %v1064_v15 }
  0x5d   : > { %v681_v18 = vld.sshfl [vmem:[#allocation1] sm:$0xff pattern:$0x73625140] }
  0x5e   : > { %1071 = vmatmul.msk.bf16.vlgmr.msrb.gmra.mxu2 %vm260_vm0, %v681_v18  ;;  %715 = vst [vmem:[#allocation1] ss:$4 sm:$0xff] %v1072_v16 }
  0x5f   : > { %718 = vst [vmem:[#allocation1 + $0x1] ss:$4 sm:$0xff] %v1073_v17 }
  0x60   : > { %721 = vst [vmem:[#allocation1 + $0x2] ss:$4 sm:$0xff] %v1074_v19 }
  0x61   : > { %724 = vst [vmem:[#allocation1 + $0x3] ss:$4 sm:$0xff] %v1075_v20 }
  0x68   : > { %v725_v60 = vld.sshfl [vmem:[#allocation1] sm:$0xff pattern:$0x73625140] }
  0x69   : > { %1082 = vmatmul.msk.bf16.vlgmr.msrb.gmra.mxu3 %vm260_vm0, %v725_v60  ;;  %842 = vst [vmem:[#allocation1] ss:$4 sm:$0xff] %v798_v62 }
  0x6a   : > { %845 = vst [vmem:[#allocation1 + $0x1] ss:$4 sm:$0xff] %v811_v5 }
  0x6b   : > { %848 = vst [vmem:[#allocation1 + $0x2] ss:$4 sm:$0xff] %v824_v8 }
  0x6c   : > { %851 = vst [vmem:[#allocation1 + $0x3] ss:$4 sm:$0xff] %v837_v14 }
  0x73   : > { %v852_v21 = vld.sshfl [vmem:[#allocation1] sm:$0xff pattern:$0x73625140] }
  0x74   : > { %1093 = vmatmul.msk.bf16.vlgmr.msra.gmra.mxu0 %vm260_vm0, %v852_v21 }
  0x99   : > { %v272_v22 = vpop.f32.mrf.mxu0 }
  0xa1   : > { %v274_v24 = vpop.f32.mrf.mxu0 }
  0xa4   : > { %v306_v23 = vpop.f32.mrf.mxu1 }
  0xa5   : > { %v307_v28 = vadd.f32 %v306_v23, %v272_v22 }
  0xac   : > { %v308_v27 = vpop.f32.mrf.mxu1 }
  0xad   : > { %v309_v35 = vadd.f32 %v308_v27, %v274_v24 }
  0xb5   : > { %v440_v25 = vpop.f32.mrf.mxu2 }
  0xb6   : > { %v445_v31 = vadd.f32 %v440_v25, %v307_v28 }
  0xbd   : > { %v442_v30 = vpop.f32.mrf.mxu2 }
  0xbe   : > { %v446_v39 = vadd.f32 %v442_v30, %v309_v35 }
  0xc0   : > { %v484_v26 = vpop.f32.mrf.mxu3 }
  0xc1   : > { %v489_v34 = vadd.f32 %v484_v26, %v445_v31 }
  0xc5   : > { %v528_v29 = vpop.f32.mrf.mxu0 }
  0xc6   : > { %v533_v38 = vadd.f32 %v528_v29, %v489_v34 }
  0xc8   : > { %v486_v32 = vpop.f32.mrf.mxu3 }
  0xc9   : > { %v490_v40 = vadd.f32 %v486_v32, %v446_v39 }
  0xcd   : > { %v530_v37 = vpop.f32.mrf.mxu0 }
  0xce   : > { %v534_v44 = vadd.f32 %v530_v37, %v490_v40 }
  0xd0   : > { %v655_v33 = vpop.f32.mrf.mxu1 }
  0xd1   : > { %v660_v42 = vadd.f32 %v655_v33, %v533_v38 }
  0xd8   : > { %v657_v43 = vpop.f32.mrf.mxu1 }
  0xd9   : > { %v661_v48 = vadd.f32 %v657_v43, %v534_v44 }
  0xe1   : > { %v699_v36 = vpop.f32.mrf.mxu2 }
  0xe2   : > { %v704_v45 = vadd.f32 %v699_v36, %v660_v42 }
  0xe9   : > { %v701_v46 = vpop.f32.mrf.mxu2 }
  0xea   : > { %v705_v50 = vadd.f32 %v701_v46, %v661_v48 }
  0xec   : > { %v743_v41 = vpop.f32.mrf.mxu3 }
  0xed   : > { %v748_v49 = vadd.f32 %v743_v41, %v704_v45 }
  0xf1   : > { %v870_v47 = vpop.f32.mrf.mxu0 }
  0xf2   : > { %v875_v52 = vadd.f32 %v870_v47, %v748_v49 }
  0xf4   : > { %v745_v51 = vpop.f32.mrf.mxu3  ;;  %v881_v56 = vadd.f32 %v1136_v53, %v875_v52 }
  0xf5   : > { %v749_v54 = vadd.f32 %v745_v51, %v705_v50 }
  0xf6   : > { %v883_v59 = vmax.f32 %v881_v56, 0.0 }
  0xf9   : > { %v872_v55 = vpop.f32.mrf.mxu0 }
  0xfa   : > { %v876_v57 = vadd.f32 %v872_v55, %v749_v54 }
  0xfc   : > { %v882_v58 = vadd.f32 %v1136_v53, %v876_v57 }
  0xfe   : > { %v884_v61 = vmax.f32 %v882_v58, 0.0 }
 0x100   : > { %v1109_v62 = vpack.c.bf16 %v884_v61, %v883_v59 }
 0x102   : > { %1110 = vst [vmem:[%s226_s21] sm:$0xff] %v1109_v62  }
 0x103 PF: > { %s13_s14 = sadd.s32 1, %s1159_s14   ;;  %s1374_s12 = smov %s1155_s13 }
 0x104   : > { %p10_p6 = scmp.ge.s32.totalorder %s13_s14, 4   ;;  %s1375_s13 = smov %s1377_s15 }
 0x106   :  { %12 = sbr.rel (!%p10_p6) target bundleno = 2 (0x2), region = 108 }

// kernel: concat_model_forward.5
= control target key start
LH: loop header
LB: loop body
LE: loop exit
PB: predicated region body
PF: predicated region fallthrough
CT: control target
= control target key end

     0   :  { %s1083_s18 = smov 0   ;;  %s1308_s0 = inlined_call_operand.vmem [shape: bf16[8,3,3,32], index: 0, kind: input, shape index: {}]   ;;  %s1309_s1 = inlined_call_operand.vmem [shape: bf16[9,32,128], index: 1, kind: input, shape index: {}]   ;;  %s1310_s2 = inlined_call_operand.vmem [shape: f32[1,128], index: 2, kind: input, shape index: {}]   ;;  %s1311_s3 = inlined_call_operand.vmem [shape: f32[128,128], index: 3, kind: input, shape index: {}]   ;;  %s1312_s4 = inlined_call_operand.vmem [shape: f32[1,128], index: 4, kind: input, shape index: {}]   ;;  %s1313_s5 = inlined_call_operand.vmem [shape: f32[2,1,128], index: 5, kind: output, shape index: {}]  }
   0x1 LB: > { %s1089_s19 = sadd.s32 4294967295, %s1050_s18   ;;  %p875_p0 = scmp.ge.s32.totalorder %s1050_s18, 1  ;;  %s1050_s18 = sphi %s1083_s18, %s15_s18  }
   0x2   : > { %p189_p1 = scmp.lt.s32.totalorder %s1050_s18, 3 }
   0x4   : > { %p190_p2 = pnand %p875_p0, %p189_p1 }
   0x5   : > { %s876_s22 = sshll.u32 (!%p190_p2), %s1089_s19, 2  ;;  %p223_p4 = scmp.lt.s32.totalorder (!%p190_p2), %s1089_s19, 1 }
   0x6   : > { %193 = sbr.rel (%p190_p2) target bundleno = 373 (0x175), region = 40  ;;  %p217_p3 = scmp.lt.s32.totalorder (!%p190_p2), %s876_s22, 7 }
   0xb   : > { %v1014_v0 = vld [vmem:[%s1309_s1 + $0x8] sm:$0xff]  ;;  %v1016_v1 = vld [vmem:[%s1309_s1 + $0x18] sm:$0xff]  ;;  %v1013_v3 = vld [vmem:[%s1309_s1] sm:$0xff]  ;;  %s1321_s22 = smov (!%p217_p3, %s876_s22), 7  ;;  %vm348_vm0 = vsmask.f32 256 }
   0xc   : > { %v1020_v2 = vld [vmem:[%s1309_s1 + $0x38] sm:$0xff]  ;;  %301 = vmatpush.bf16.msra.mxu2 %v1014_v0  ;;  %268 = vmatpush.bf16.msra.mxu0 %v1016_v1  ;;  %v1015_v4 = vld [vmem:[%s1309_s1 + $0x10] sm:$0xff]  ;;  %v1018_v5 = vld [vmem:[%s1309_s1 + $0x28] sm:$0xff]  ;;  %vm349_vm1 = vsmask.f32 1284  ;;  %s1031_s10 = smul.u32 6, %s1321_s22 }
   0xd   : > { %452 = vmatpush.bf16.msra.mxu3 %v1020_v2  ;;  %v1019_v6 = vld [vmem:[%s1309_s1 + $0x30] sm:$0xff]  ;;  %vm350_vm2 = vmor %vm348_vm0, %vm349_vm1  ;;  %vm351_vm3 = vsmask.f32 2312  ;;  %vm353_vm5 = vsmask.f32 3340  ;;  %v1017_v8 = vld [vmem:[%s1309_s1 + $0x20] sm:$0xff] }
   0xe   : > { %vm1115_vm4 = vmor %vm350_vm2, %vm351_vm3  ;;  %s1122_s13 = scalar_lea.vmem %s1308_s0, %s1031_s10  ;;  %vm318_vm6 = vcmask 1040384   ;;  %vm322_vm7 = vcmask 1042434   ;;  %vm328_vm8 = vcmask 1041409   ;;  %vm330_vm9 = vcmask 1043459   ;;  %v1022_v21 = vld [vmem:[%s1309_s1 + $0x48] sm:$0xff]  ;;  %v1024_v22 = vld [vmem:[%s1309_s1 + $0x58] sm:$0xff] }
   0xf   : > { %v878_v9 = vld [vmem:[%s1122_s13 + $0x6] sm:$0x1]  ;;  %vm332_vm10 = vcmask 1042433   ;;  %vm355_vm11 = vsmask.f32 4368  ;;  %vm354_vm12 = vmor %vm1115_vm4, %vm353_vm5  ;;  %vm326_vm15 = vcmask 1041408   ;;  %583 = vmatpush.bf16.msra.mxu1 %v1024_v22 }
  0x10   : > { %302 = vmatpush.bf16.msra.mxu2 %v1013_v3  ;;  %269 = vmatpush.bf16.msra.mxu0 %v1015_v4  ;;  %v879_v10 = vld [vmem:[%s1122_s13 + $0x8] sm:$0x1]  ;;  %242 = vst [vmem:[#allocation1] ss:$9 sm:$0xff] %v878_v9  ;;  %v308_v11 = vld [vmem:[%s1122_s13] sm:$0x3]  ;;  %vm356_vm13 = vmor %vm354_vm12, %vm355_vm11 }
  0x11   : > { %453 = vmatpush.bf16.msra.mxu3 %v1019_v6  ;;  %245 = vst [vmem:[#allocation1 + $0x1] ss:$9 sm:$0xff] %v879_v10  ;;  %v309_v12 = vld [vmem:[%s1122_s13 + $0x2] sm:$0x3]  ;;  %v312_v13 = vrot.slane %v308_v11, 1  ;;  %v313_v14 = vrot.slane %v308_v11, 2 }
  0x12   : > { %v314_v15 = vrot.slane %v308_v11, 3  ;;  %v315_v16 = vrot.slane %v309_v12, 1  ;;  %v316_v17 = vrot.slane %v309_v12, 2  ;;  %v317_v18 = vrot.slane %v309_v12, 3  ;;  %v227_v27 = vld [vmem:[%s1122_s13] sm:$0x1] }
  0x13   : > { %v329_v19 = vsel %vm328_vm8, %v308_v11, %v312_v13  ;;  %vm357_vm14 = vsmask.f32 5396  ;;  %v321_v23 = vsel %vm318_vm6, %v308_v11, %v312_v13  ;;  %vm359_vm1 = vsmask.f32 6424  ;;  %v1021_v32 = vld [vmem:[%s1309_s1 + $0x40] sm:$0xff]  ;;  %v1023_v45 = vld [vmem:[%s1309_s1 + $0x50] sm:$0xff] }
  0x14   : > { %410 = vmatpush.bf16.msrb.mxu2 %v1018_v5  ;;  %v331_v20 = vsel %vm330_vm9, %v313_v14, %v314_v15  ;;  %v325_v24 = vsel %vm322_vm7, %v313_v14, %v314_v15  ;;  %v343_v26 = vsel %vm328_vm8, %v309_v12, %v315_v16  ;;  %v338_v28 = vsel %vm318_vm6, %v309_v12, %v315_v16  ;;  %vm1151_vm0 = vmor %vm356_vm13, %vm357_vm14  ;;  %v228_v33 = vld [vmem:[%s1122_s13 + $0x2] sm:$0x1]  ;;  %v1026_v47 = vld [vmem:[%s1309_s1 + $0x68] sm:$0xff]  ;;  %s1323_s19 = smov (!%p223_p4, %s1089_s19), 1 }
  0x15   : > { %v333_v25 = vsel %vm332_vm10, %v329_v19, %v331_v20  ;;  %v341_v29 = vsel %vm322_vm7, %v316_v17, %v317_v18  ;;  %v344_v30 = vsel %vm330_vm9, %v316_v17, %v317_v18  ;;  %494 = vmatpush.bf16.msrb.mxu0 %v1022_v21  ;;  %vm259_vm2 = vcmask 261120   ;;  %vm360_vm3 = vmor %vm1151_vm0, %vm359_vm1  ;;  %584 = vmatpush.bf16.msra.mxu1 %v1023_v45  ;;  %v947_v50 = vld [vmem:[%s1122_s13 + $0xc] sm:$0x3]  ;;  %v948_v51 = vld [vmem:[%s1122_s13 + $0xe] sm:$0x3]  ;;  %s225_s30 = scalar_lea.vmem %s1313_s5, %s1323_s19 }
  0x16   : > { %v335_v34 = vrot.slane %v333_v25, 1  ;;  %v345_v35 = vsel %vm332_vm10, %v343_v26, %v344_v30  ;;  %v327_v37 = vsel %vm326_vm15, %v321_v23, %v325_v24  ;;  %v342_v39 = vsel %vm326_vm15, %v338_v28, %v341_v29  ;;  %v1028_v52 = vld [vmem:[%s1309_s1 + $0x78] sm:$0xff]  ;;  %v1025_v53 = vld [vmem:[%s1309_s1 + $0x60] sm:$0xff]  ;;  %v917_v54 = vld [vmem:[%s1122_s13 + $0xc] sm:$0x1] }
  0x17   : > { %v347_v38 = vrot.slane %v345_v35, 1  ;;  %vm361_vm4 = vsmask.f32 7452  ;;  %v363_v40 = vshrl.u32 %v327_v37, 16  ;;  %v371_v43 = vshrl.u32 %v342_v39, 16  ;;  %667 = vmatpush.bf16.msrb.mxu3 %v1028_v52  ;;  %v1027_v7 = vld [vmem:[%s1309_s1 + $0x70] sm:$0xff] }
  0x18   : > { %411 = vmatpush.bf16.msrb.mxu2 %v1017_v8  ;;  %v246_v36 = vld [vmem:[#allocation1] sm:$0xff]  ;;  %v368_v41 = vshll.u32 %v335_v34, 16  ;;  %vm1165_vm5 = vmor %vm360_vm3, %vm361_vm4  ;;  %v506_v55 = vrot.slane %v947_v50, 1  ;;  %v507_v56 = vrot.slane %v947_v50, 2  ;;  %v508_v57 = vrot.slane %v947_v50, 3  ;;  %v1030_v8 = vld [vmem:[%s1309_s1 + $0x88] sm:$0xff] }
  0x19   : > { %276 = vst [vmem:[#allocation1] ss:$9 sm:$0xff] %v227_v27  ;;  %892 = vmatmul.msk.bf16.vlgmr.msra.gmra.mxu0 %vm259_vm2, %v246_v36  ;;  %v376_v44 = vshll.u32 %v347_v38, 16  ;;  %v918_v58 = vld [vmem:[%s1122_s13 + $0xe] sm:$0x1]  ;;  %v509_v59 = vrot.slane %v948_v51, 1 }
  0x1a   : > { %279 = vst [vmem:[#allocation1 + $0x1] ss:$9 sm:$0xff] %v228_v33  ;;  %495 = vmatpush.bf16.msrb.mxu0 %v1021_v32  ;;  %v370_v46 = vsel %vm1165_vm5, %v363_v40, %v368_v41  ;;  %v510_v60 = vrot.slane %v948_v51, 2  ;;  %v511_v61 = vrot.slane %v948_v51, 3  ;;  %v519_v63 = vsel %vm328_vm8, %v947_v50, %v506_v55  ;;  %v932_v9 = vld [vmem:[%s1122_s13 + $0x12] sm:$0x1] }
  0x1b   : > { %v378_v48 = vsel %vm1165_vm5, %v371_v43, %v376_v44  ;;  %v520_v0 = vsel %vm330_vm9, %v507_v56, %v508_v57  ;;  %v531_v1 = vsel %vm328_vm8, %v948_v51, %v509_v59  ;;  %v514_v4 = vsel %vm318_vm6, %v947_v50, %v506_v55  ;;  %v933_v12 = vld [vmem:[%s1122_s13 + $0x14] sm:$0x1]  ;;  %668 = vmatpush.bf16.msrb.mxu3 %v1027_v7  ;;  %v1029_v22 = vld [vmem:[%s1309_s1 + $0x80] sm:$0xff] }
  0x1c   : > { %v532_v2 = vsel %vm330_vm9, %v510_v60, %v511_v61  ;;  %v521_v3 = vsel %vm332_vm10, %v519_v63, %v520_v0  ;;  %v517_v5 = vsel %vm322_vm7, %v507_v56, %v508_v57  ;;  %v526_v10 = vsel %vm318_vm6, %v948_v51, %v509_v59  ;;  %v994_v26 = vld [vmem:[%s1122_s13 + $0x2] sm:$0x3]  ;;  %v995_v27 = vld [vmem:[%s1122_s13 + $0x4] sm:$0x3]  ;;  %v800_v42 = vld [vmem:[%s1311_s3 + $0x70] sm:$0xff] }
  0x1d   : > { %v533_v6 = vsel %vm332_vm10, %v531_v1, %v532_v2  ;;  %v529_v11 = vsel %vm322_vm7, %v510_v60, %v511_v61  ;;  %v523_v13 = vrot.slane %v521_v3, 1  ;;  %v518_v15 = vsel %vm326_vm15, %v514_v4, %v517_v5  ;;  %v964_v28 = vld [vmem:[%s1122_s13 + $0x2] sm:$0x1]  ;;  %v965_v32 = vld [vmem:[%s1122_s13 + $0x4] sm:$0x1]  ;;  %v801_v3 = vld [vmem:[%s1311_s3 + $0x78] sm:$0xff] }
  0x1e   : > { %v535_v16 = vrot.slane %v533_v6, 1  ;;  %756 = vmatpush.bf16.msra.mxu0 %v1030_v8  ;;  %v530_v17 = vsel %vm326_vm15, %v526_v10, %v529_v11  ;;  %v536_v18 = vshrl.u32 %v518_v15, 16  ;;  %v679_v29 = vrot.slane %v994_v26, 1  ;;  %803 = vmatpush.msrb.mxu1 %v801_v3  ;;  %v799_v5 = vld [vmem:[%s1311_s3 + $0x68] sm:$0xff]  ;;  %v798_v7 = vld [vmem:[%s1311_s3 + $0x60] sm:$0xff]  ;;  %v796_v11 = vld [vmem:[%s1311_s3 + $0x50] sm:$0xff] }
  0x1f   : > { %v541_v19 = vshll.u32 %v523_v13, 16  ;;  %v544_v20 = vshrl.u32 %v530_v17, 16  ;;  %v680_v30 = vrot.slane %v994_v26, 2  ;;  %v681_v31 = vrot.slane %v994_v26, 3  ;;  %v795_v13 = vld [vmem:[%s1311_s3 + $0x48] sm:$0xff]  ;;  %v794_v15 = vld [vmem:[%s1311_s3 + $0x40] sm:$0xff] }
  0x20   : > { %v549_v21 = vshll.u32 %v535_v16, 16  ;;  %v682_v33 = vrot.slane %v995_v27, 1  ;;  %v683_v34 = vrot.slane %v995_v27, 2  ;;  %v684_v35 = vrot.slane %v995_v27, 3  ;;  %804 = vmatpush.msrb.mxu1 %v800_v42  ;;  %v793_v17 = vld [vmem:[%s1311_s3 + $0x38] sm:$0xff] }
  0x21   : > { %v280_v49 = vld [vmem:[#allocation1] sm:$0xff]  ;;  %v543_v23 = vsel %vm1165_vm5, %v536_v18, %v541_v19  ;;  %v692_v37 = vsel %vm328_vm8, %v994_v26, %v679_v29  ;;  %v693_v38 = vsel %vm330_vm9, %v680_v30, %v681_v31  ;;  %v687_v43 = vsel %vm318_vm6, %v994_v26, %v679_v29  ;;  %v792_v18 = vld [vmem:[%s1311_s3 + $0x30] sm:$0xff]  ;;  %v791_v19 = vld [vmem:[%s1311_s3 + $0x28] sm:$0xff] }
  0x22   : > { %901 = vmatmul.msk.bf16.vlgmr.msra.gmra.mxu2 %vm259_vm2, %v280_v49  ;;  %385 = vst [vmem:[#allocation1] ss:$9 sm:$0xff] %v370_v46  ;;  %v551_v24 = vsel %vm1165_vm5, %v544_v20, %v549_v21  ;;  %757 = vmatpush.bf16.msra.mxu0 %v1029_v22  ;;  %v704_v39 = vsel %vm328_vm8, %v995_v27, %v682_v33  ;;  %v979_v46 = vld [vmem:[%s1122_s13 + $0x8] sm:$0x1]  ;;  %v980_v49 = vld [vmem:[%s1122_s13 + $0xa] sm:$0x1] }
  0x23   : > { %388 = vst [vmem:[#allocation1 + $0x1] ss:$9 sm:$0xff] %v378_v48  ;;  %625 = vmatpush.bf16.msra.mxu2 %v1026_v47  ;;  %v705_v40 = vsel %vm330_vm9, %v683_v34, %v684_v35  ;;  %v694_v41 = vsel %vm332_vm10, %v692_v37, %v693_v38  ;;  %v690_v44 = vsel %vm322_vm7, %v680_v30, %v681_v31  ;;  %v790_v21 = vld [vmem:[%s1311_s3 + $0x20] sm:$0xff]  ;;  %v789_v22 = vld [vmem:[%s1311_s3 + $0x18] sm:$0xff]  ;;  %v787_v26 = vld [vmem:[%s1311_s3 + $0x8] sm:$0xff]  ;;  %v1052_v31 = vmov 4.0  }
  0x24   : > { %v706_v45 = vsel %vm332_vm10, %v704_v39, %v705_v40  ;;  %v699_v47 = vsel %vm318_vm6, %v995_v27, %v682_v33  ;;  %v702_v48 = vsel %vm322_vm7, %v683_v34, %v684_v35  ;;  %v696_v50 = vrot.slane %v694_v41, 1  ;;  %805 = vmatpush.msrb.mxu1 %v799_v5  ;;  %v786_v27 = vld [vmem:[%s1311_s3] sm:$0xff] }
  0x25   : > { %v691_v52 = vsel %vm326_vm15, %v687_v43, %v690_v44  ;;  %1042 = vrcp.f32 %v1052_v31  ;;  %v1041_v38 = vld [vmem:[%s1310_s2] ss:$0 sm:$0xff]  ;;  %vm770_vm6 = vcmask 1043456  }
  0x26   : > { %v709_v55 = vshrl.u32 %v691_v52, 16  ;;  %v714_v56 = vshll.u32 %v696_v50, 16  ;;  %806 = vmatpush.msrb.mxu1 %v798_v7 }
  0x27   : > { %626 = vmatpush.bf16.msra.mxu2 %v1025_v53  ;;  %v708_v53 = vrot.slane %v706_v45, 1 }
  0x28   : > { %v716_v59 = vsel %vm1165_vm5, %v709_v55, %v714_v56 }
  0x2a   : > { %v389_v62 = vld [vmem:[#allocation1] sm:$0xff] }
  0x2b   : > { %427 = vst [vmem:[#allocation1] ss:$9 sm:$0xff] %v917_v54  ;;  %v703_v54 = vsel %vm326_vm15, %v699_v47, %v702_v48 }
  0x2c   : > { %430 = vst [vmem:[#allocation1 + $0x1] ss:$9 sm:$0xff] %v918_v58  ;;  %v717_v57 = vshrl.u32 %v703_v54, 16  ;;  %v722_v58 = vshll.u32 %v708_v53, 16 }
  0x2e   : > { %v724_v60 = vsel %vm1165_vm5, %v717_v57, %v722_v58 }
  0x32   : > { %916 = vmatmul.msk.bf16.vlgmr.msrb.gmra.mxu2 %vm259_vm2, %v389_v62 }
  0x33   : > { %v431_v14 = vld [vmem:[#allocation1] sm:$0xff] }
  0x34   : > { %931 = vmatmul.msk.bf16.vlgmr.msra.gmra.mxu3 %vm259_vm2, %v431_v14  ;;  %469 = vst [vmem:[#allocation1] ss:$9 sm:$0xff] %v932_v9  ;;  %v797_v9 = vld [vmem:[%s1311_s3 + $0x58] sm:$0xff] }
  0x35   : > { %472 = vst [vmem:[#allocation1 + $0x1] ss:$9 sm:$0xff] %v933_v12  ;;  %807 = vmatpush.msrb.mxu1 %v797_v9 }
  0x37   : > { %808 = vmatpush.msrb.mxu1 %v796_v11 }
  0x39   : > { %809 = vmatpush.msrb.mxu1 %v795_v13 }
  0x3b   : > { %810 = vmatpush.msrb.mxu1 %v794_v15 }
  0x3c   : > { %v473_v25 = vld [vmem:[#allocation1] sm:$0xff] }
  0x3d   : > { %946 = vmatmul.msk.bf16.vlgmr.msrb.gmra.mxu0 %vm259_vm2, %v473_v25  ;;  %558 = vst [vmem:[#allocation1] ss:$9 sm:$0xff] %v543_v23  ;;  %811 = vmatpush.msrb.mxu1 %v793_v17 }
  0x3e   : > { %561 = vst [vmem:[#allocation1 + $0x1] ss:$9 sm:$0xff] %v551_v24  ;;  %v788_v24 = vld [vmem:[%s1311_s3 + $0x10] sm:$0xff] }
  0x3f   : > { %812 = vmatpush.msrb.mxu1 %v792_v18 }
  0x41   : > { %813 = vmatpush.msrb.mxu1 %v791_v19 }
  0x43   : > { %814 = vmatpush.msrb.mxu1 %v790_v21 }
  0x45   : > { %v562_v36 = vld [vmem:[#allocation1] sm:$0xff]  ;;  %815 = vmatpush.msrb.mxu1 %v789_v22 }
  0x46   : > { %963 = vmatmul.msk.bf16.vlgmr.msra.gmra.mxu1 %vm259_vm2, %v562_v36  ;;  %600 = vst [vmem:[#allocation1] ss:$9 sm:$0xff] %v964_v28  ;;  %v1043_v36 = vpop.eup %1042 }
  0x47   : > { %603 = vst [vmem:[#allocation1 + $0x1] ss:$9 sm:$0xff] %v965_v32  ;;  %816 = vmatpush.msrb.mxu1 %v788_v24  ;;  %v779_v41 = vmul.f32 4.0, %v1043_v36  ;;  %vm783_vm7 = vweird.f32 %v1043_v36 }
  0x49   : > { %817 = vmatpush.msrb.mxu1 %v787_v26 }
  0x4b   : > { %818 = vmatpush.msrb.mxu1 %v786_v27 }
  0x4e   : > { %v604_v51 = vld [vmem:[#allocation1] sm:$0xff] }
  0x4f   : > { %978 = vmatmul.msk.bf16.vlgmr.msra.gmra.mxu2 %vm259_vm2, %v604_v51  ;;  %642 = vst [vmem:[#allocation1] ss:$9 sm:$0xff] %v979_v46  ;;  %v780_v46 = vsub.f32 1.0, %v779_v41 }
  0x50   : > { %645 = vst [vmem:[#allocation1 + $0x1] ss:$9 sm:$0xff] %v980_v49 }
  0x51   : > { %v781_v50 = vmul.f32 %v1043_v36, %v780_v46 }
  0x53   : > { %v782_v53 = vadd.f32 %v1043_v36, %v781_v50 }
  0x55   : > { %v784_v56 = vsel %vm783_vm7, %v1043_v36, %v782_v53 }
  0x57   : > { %v646_v61 = vld [vmem:[#allocation1] sm:$0xff] }
  0x58   : > { %993 = vmatmul.msk.bf16.vlgmr.msrb.gmra.mxu3 %vm259_vm2, %v646_v61  ;;  %731 = vst [vmem:[#allocation1] ss:$9 sm:$0xff] %v716_v59  ;;  %v802_v59 = vld [vmem:[%s1312_s4] sm:$0x1] }
  0x59   : > { %734 = vst [vmem:[#allocation1 + $0x1] ss:$9 sm:$0xff] %v724_v60 }
  0x60   : > { %v735_v62 = vld [vmem:[#allocation1] sm:$0xff] }
  0x61   : > { %1010 = vmatmul.msk.bf16.vlgmr.msra.gmra.mxu0 %vm259_vm2, %v735_v62 }
  0x96   : > { %v271_v63 = vpop.f32.mrf.mxu0 }
  0x9e   : > { %v273_v0 = vpop.f32.mrf.mxu0 }
  0xa5   : > { %v304_v1 = vpop.f32.mrf.mxu2 }
  0xa6   : > { %v305_v20 = vadd.f32 %v304_v1, %v271_v63 }
  0xad   : > { %v306_v2 = vpop.f32.mrf.mxu2 }
  0xb5   : > { %v413_v4 = vpop.f32.mrf.mxu2 }
  0xb6   : > { %v417_v25 = vadd.f32 %v413_v4, %v305_v20 }
  0xb7   : > { %v455_v6 = vpop.f32.mrf.mxu3 }
  0xb8   : > { %v459_v28 = vadd.f32 %v455_v6, %v417_v25 }
  0xba   : > { %v497_v8 = vpop.f32.mrf.mxu0 }
  0xbb   : > { %v501_v30 = vadd.f32 %v497_v8, %v459_v28 }
  0xbd   : > { %v415_v10 = vpop.f32.mrf.mxu2 }
  0xbf   : > { %v457_v12 = vpop.f32.mrf.mxu3 }
  0xc2   : > { %v499_v14 = vpop.f32.mrf.mxu0 }
  0xc3   : > { %v586_v16 = vpop.f32.mrf.mxu1 }
  0xc4   : > { %v590_v32 = vadd.f32 %v586_v16, %v501_v30 }
  0xcb   : > { %v588_v23 = vpop.f32.mrf.mxu1 }
  0xd2   : > { %v628_v29 = vpop.f32.mrf.mxu2 }
  0xd3   : > { %v632_v33 = vadd.f32 %v628_v29, %v590_v32 }
  0xda   : > { %v630_v34 = vpop.f32.mrf.mxu2 }
  0xdb   : > { %v670_v35 = vpop.f32.mrf.mxu3 }
  0xdc   : > { %v674_v37 = vadd.f32 %v670_v35, %v632_v33 }
  0xde   : > { %v759_v39 = vpop.f32.mrf.mxu0 }
  0xdf   : > { %v763_v40 = vadd.f32 %v759_v39, %v674_v37 }
  0xe1   : > { %v768_v43 = vadd.f32 %v1041_v38, %v763_v40 }
  0xe3   : > { %v769_v44 = vmax.f32 %v768_v43, 0.0  ;;  %v672_v45 = vpop.f32.mrf.mxu3 }
  0xe5   : > { %v771_v47 = vsel %vm770_vm6, %v769_v44, 0.0 }
  0xe6   : > { %v772_v48 = vrot.slane %v771_v47, 4  ;;  %v761_v49 = vpop.f32.mrf.mxu0 }
  0xe8   : > { %v773_v51 = vadd.f32 %v772_v48, %v771_v47 }
  0xea   : > { %v774_v52 = vrot.slane %v773_v51, 2 }
  0xec   : > { %v775_v54 = vadd.f32 %v774_v52, %v773_v51 }
  0xee   : > { %v776_v55 = vrot.slane %v775_v54, 1 }
  0xf0   : > { %v777_v57 = vadd.f32 %v776_v55, %v775_v54 }
  0xf2   : > { %v785_v58 = vmul.f32 %v784_v56, %v777_v57 }
  0xf4   : > { %819 = vmatmul.f32.vlgmr.msrb.gmra.mxu1 %v785_v58 }
 0x171   : > { %v820_v60 = vpop.f32.mrf.mxu1 }
 0x172   : > { %v821_v61 = vadd.f32 %v820_v60, %v802_v59 }
 0x174   : > { %823 = vst [vmem:[%s225_s30] sm:$0x1] %v821_v61 }
 0x175 PF: > { %s15_s18 = sadd.s32 1, %s1050_s18  }
 0x176   : > { %p12_p5 = scmp.ge.s32.totalorder %s15_s18, 4  }
 0x178   :  { %14 = sbr.rel (!%p12_p5) target bundleno = 1 (0x1), region = 92 }

</bundles_post_ra>
